<compile_context>
chip_gen: v7x
topology: tpu7x:2x2x1
jax: 0.10.0
libtpu: 0.0.40
codegen_flags: <defaults>
</compile_context>

<pallas_src>
import functools
import math

import jax
import jax.numpy as jnp
from jax import lax
from jax.experimental import pallas as pl
from jax.experimental.pallas import tpu as pltpu


def _lstm_kernel(x_ref, wx_ref, wh_ref, b_ref, out_ref,
                 zx_ref, h_ref, c_ref, *, unroll):
    """One (batch-tile, time-chunk) grid step.

    x_ref:   (TT, TB, E)   bf16   input chunk
    wx_ref:  (E, 4H)       bf16   fused gate weights, gate order (g|i|f|o)
    wh_ref:  (H, 4H)       bf16
    b_ref:   (1, 4H)       f32    fused biases
    out_ref: (TT, TB, H)   f32    hidden states for this chunk
    zx_ref:  (TT, TB, 4H)  f32    VMEM scratch: hoisted x@Wx + b
    h_ref:   (TB, H)       bf16   VMEM scratch: hidden carry across chunks
    c_ref:   (TB, H)       f32    VMEM scratch: cell   carry across chunks
    """
    TT, TB, E = x_ref.shape
    H = out_ref.shape[-1]

    # First time chunk of each batch tile: h0 = 0, c0 = 1 (as in the module).
    @pl.when(pl.program_id(1) == 0)
    def _():
        h_ref[...] = jnp.zeros_like(h_ref)
        c_ref[...] = jnp.ones_like(c_ref)

    # Prologue (off the serial path): input projection + bias hoisted out of
    # the recurrence.  One matmul with M = TT*TB rows fills the MXU instead of
    # TT tiny M = TB matmuls; bias is added once per chunk, not per step.
    x_flat = x_ref[...].reshape(TT * TB, E)
    zx = jnp.dot(x_flat, wx_ref[...],
                 preferred_element_type=jnp.float32) + b_ref[...]
    zx_ref[...] = zx.reshape(TT, TB, 4 * H)

    wh = wh_ref[...]                # resident for the whole chunk
    h0 = h_ref[...]                 # bf16 carry (matmul operand dtype)
    c0 = c_ref[...]                 # f32 carry

    def step(t, carry):
        h, c = carry
        # Only the recurrent matmul remains on the serial critical path.
        z = zx_ref[t] + jnp.dot(h, wh, preferred_element_type=jnp.float32)
        g = jnp.tanh(z[:, :H])
        # One contiguous sigmoid over the i|f|o block: 2 EUP streams / step.
        s = jax.nn.sigmoid(z[:, H:])
        i = s[:, 0 * H:1 * H]
        f = s[:, 1 * H:2 * H]
        o = s[:, 2 * H:3 * H]
        c = g * i + c * f
        h_f32 = jnp.tanh(c) * o
        out_ref[t] = h_f32.astype(out_ref.dtype)        # lane-dense store
        return (h_f32.astype(jnp.bfloat16), c)

    h, c = lax.fori_loop(0, TT, step, (h0, c0), unroll=unroll)

    # Persist the carry for the next time chunk of this batch tile.
    h_ref[...] = h
    c_ref[...] = c


def _pick_batch_tile(B):
    # 128 fills the MXU M-dim on v5e (128x128 MXUs), keeps vreg/spill pressure
    # modest, and yields >= 2 "parallel" grid steps on v7x (2 TCs) as soon as
    # B >= 256.  On v6e a 256 tile would be marginally better, but 128 is a
    # safe cross-generation default.
    return 128 if B % 128 == 0 else B


def _pick_time_chunk(T):
    # Bound the per-chunk (TT, TB, *) slabs so the double-buffered pipeline
    # fits VMEM on every generation (v7x has only 64 MiB physical).
    if T <= 32:
        return T
    for tt in (32, 16, 8, 4, 2):
        if T % tt == 0:
            return tt
    return 1


def fuse_lstm_params(wx, wh, b):
    """Fuse per-gate params (gate order g,i,f,o) once, OUTSIDE the jit path."""
    wx_f = jnp.concatenate(list(wx), axis=-1).astype(jnp.bfloat16)   # (E, 4H)
    wh_f = jnp.concatenate(list(wh), axis=-1).astype(jnp.bfloat16)   # (H, 4H)
    b_f = jnp.concatenate(list(b), axis=-1).astype(jnp.float32)      # (1, 4H)
    return wx_f, wh_f, b_f


@jax.jit
def lstm_forward(embeds, wx_f, wh_f, b_f):
    """embeds: [T, B, E] f32; wx_f: [E, 4H] bf16; wh_f: [H, 4H] bf16;
    b_f: [1, 4H] f32.  Returns [T, B, H] f32."""
    T, B, E = embeds.shape
    H = wh_f.shape[0]
    # Output kept f32 to match the module; bf16 would halve the output slab /
    # HBM writeback if the consumer tolerates it.
    out_dtype = jnp.float32

    # NOTE: H should be a multiple of 128 so the fused 4H gate slices stay
    # lane-aligned; other H values are correct but force XLU relayouts.
    x = embeds.astype(jnp.bfloat16)

    TB = _pick_batch_tile(B)
    TT = _pick_time_chunk(T)
    # Partial unroll: keep the loop body visible to the scheduler without
    # exploding code size / live ranges for long chunks.
    unroll = TT if TT <= 8 else (2 if TB >= 256 else 4)

    # VMEM budget derived from the actual block footprint (double-buffered
    # inputs/outputs + weights + scratch), capped safely below v7x's 64 MiB.
    def nbytes(shape, dt):
        return math.prod(shape) * jnp.dtype(dt).itemsize

    footprint = (
        2 * nbytes((TT, TB, E), jnp.bfloat16)           # x, double-buffered
        + 2 * nbytes((TT, TB, H), out_dtype)            # out, double-buffered
        + 2 * (nbytes((E, 4 * H), jnp.bfloat16)         # weights / bias
               + nbytes((H, 4 * H), jnp.bfloat16)
               + nbytes((1, 4 * H), jnp.float32))
        + nbytes((TT, TB, 4 * H), jnp.float32)          # zx scratch
        + nbytes((TB, H), jnp.bfloat16)                 # h carry
        + nbytes((TB, H), jnp.float32)                  # c carry
    )
    vmem_limit = int(min(48 * 1024 * 1024,
                         max(16 * 1024 * 1024, 2 * footprint)))

    kernel = functools.partial(_lstm_kernel, unroll=unroll)

    grid_spec = pltpu.PrefetchScalarGridSpec(
        num_scalar_prefetch=0,
        grid=(B // TB, T // TT),            # (batch tiles, time chunks)
        in_specs=[
            pl.BlockSpec((TT, TB, E), lambda bi, ti: (ti, bi, 0)),    # x
            # TODO(synk): pipeline_mode=pl.Buffered(1) on the constant-index
            # weight blocks would halve their VMEM; left at default buffering
            # for compatibility.
            pl.BlockSpec((E, 4 * H), lambda bi, ti: (0, 0)),          # Wx
            pl.BlockSpec((H, 4 * H), lambda bi, ti: (0, 0)),          # Wh
            pl.BlockSpec((1, 4 * H), lambda bi, ti: (0, 0)),          # bias
        ],
        out_specs=pl.BlockSpec((TT, TB, H), lambda bi, ti: (ti, bi, 0)),
        scratch_shapes=[
            pltpu.VMEM((TT, TB, 4 * H), jnp.float32),   # hoisted x@Wx + b
            pltpu.VMEM((TB, H), jnp.bfloat16),          # h carry across chunks
            pltpu.VMEM((TB, H), jnp.float32),           # c carry across chunks
        ],
    )

    return pl.pallas_call(
        kernel,
        out_shape=jax.ShapeDtypeStruct((T, B, H), out_dtype),
        grid_spec=grid_spec,
        compiler_params=pltpu.CompilerParams(
            # Batch tiles are independent (megacore-parallel); the time axis
            # carries the h/c recurrence through scratch -> "arbitrary".
            dimension_semantics=("parallel", "arbitrary"),
            vmem_limit_bytes=vmem_limit,
        ),
    )(x, wx_f, wh_f, b_f)


def lstm_reference(embeds, wx, wh, b):
    """Pure-JAX f32 reference matching the PyTorch forward."""
    T, B, E = embeds.shape
    H = wh.shape[-1]
    h0 = jnp.zeros((B, H), jnp.float32)
    c0 = jnp.ones((B, H), jnp.float32)

    def step(carry, x):
        h, c = carry
        g = jnp.tanh(x @ wx[0] + h @ wh[0] + b[0])
        i = jax.nn.sigmoid(x @ wx[1] + h @ wh[1] + b[1])
        f = jax.nn.sigmoid(x @ wx[2] + h @ wh[2] + b[2])
        o = jax.nn.sigmoid(x @ wx[3] + h @ wh[3] + b[3])
        c = g * i + c * f
        h = jnp.tanh(c) * o
        return (h, c), h

    _, out = jax.lax.scan(step, (h0, c0), embeds)
    return out


if __name__ == "__main__":
    # Small shapes consistent with the module's forward: [T, B, E] input.
    # H is a multiple of 128 so the fused 4H gate slices are vreg-aligned.
    T, B, E, H = 8, 8, 128, 128
    key = jax.random.PRNGKey(0)
    k_embeds, k_wx, k_wh = jax.random.split(key, 3)

    # Deterministic parameter init matching the module:
    # weights ~ U(-1/sqrt(H), 1/sqrt(H)); biases: bg=0, bi=0, bf=1, bo=0.
    r = 1.0 / math.sqrt(H)
    wx = jax.random.uniform(k_wx, (4, E, H), jnp.float32, minval=-r, maxval=r)
    wh = jax.random.uniform(k_wh, (4, H, H), jnp.float32, minval=-r, maxval=r)
    b = jnp.stack([
        jnp.zeros((1, H), jnp.float32),   # bg
        jnp.zeros((1, H), jnp.float32),   # bi
        jnp.ones((1, H), jnp.float32),    # bf (forget-gate bias = 1)
        jnp.zeros((1, H), jnp.float32),   # bo
    ], axis=0)                            # (4, 1, H)

    embeds = jax.random.normal(k_embeds, (T, B, E), jnp.float32)

    # Fuse the per-gate weights once, outside the per-call jit path.
    wx_f, wh_f, b_f = fuse_lstm_params(wx, wh, b)

    out = jax.block_until_ready(lstm_forward(embeds, wx_f, wh_f, b_f))
    ref = jax.block_until_ready(lstm_reference(embeds, wx, wh, b))

    assert out.shape == (T, B, H), out.shape
    # Tolerance relaxed vs. pure-f32 because matmul operands are bf16 (with
    # f32 MXU accumulation); outputs are tanh-bounded so atol dominates.
    assert jnp.allclose(out, ref, atol=5e-2, rtol=5e-2), "mismatch vs reference"
    print("KERNEL_OK")
</pallas_src>

<mosaic_0001>
module attributes {stable_mosaic.version = 11 : i64} {
  func.func @_lstm_kernel(%arg0: i32, %arg1: i32, %arg2: memref<8x8x128xbf16, #tpu.memory_space<vmem>>, %arg3: memref<128x512xbf16, #tpu.memory_space<vmem>>, %arg4: memref<128x512xbf16, #tpu.memory_space<vmem>>, %arg5: memref<1x512xf32, #tpu.memory_space<vmem>>, %arg6: memref<8x8x128xf32, #tpu.memory_space<vmem>>, %arg7: memref<8x8x512xf32, #tpu.memory_space<vmem>>, %arg8: memref<8x128xbf16, #tpu.memory_space<vmem>>, %arg9: memref<8x128xf32, #tpu.memory_space<vmem>>) attributes {dimension_semantics = [#tpu.dimension_semantics<parallel>, #tpu.dimension_semantics<arbitrary>], iteration_bounds = array<i64: 1, 1>, scalar_prefetch = 0 : i64, scratch_operands = 3 : i64, tpu.core_type = #tpu.core_type<tc>, window_params = [{transform_indices = @transform_0, window_bounds = array<i64: 8, 8, 128>}, {pipeline_mode = #tpu.pipeline_mode<synchronous>, transform_indices = @transform_1, window_bounds = array<i64: 128, 512>}, {pipeline_mode = #tpu.pipeline_mode<synchronous>, transform_indices = @transform_2, window_bounds = array<i64: 128, 512>}, {pipeline_mode = #tpu.pipeline_mode<synchronous>, transform_indices = @transform_3, window_bounds = array<i64: 1, 512>}, {transform_indices = @transform_4, window_bounds = array<i64: 8, 8, 128>}]} {
    %c0_i32 = arith.constant 0 : i32
    %0 = arith.cmpi eq, %arg1, %c0_i32 : i32
    %1 = arith.extui %0 : i1 to i32
    %c0_i32_0 = arith.constant 0 : i32
    %2 = arith.cmpi ne, %1, %c0_i32_0 : i32
    scf.if %2 {
      %cst_69 = arith.constant 0.000000e+00 : bf16
      %225 = vector.broadcast %cst_69 : bf16 to vector<8x128xbf16>
      %c0_70 = arith.constant 0 : index
      %c0_71 = arith.constant 0 : index
      %226 = vector.load %arg8[%c0_70, %c0_71] : memref<8x128xbf16, #tpu.memory_space<vmem>>, vector<8x128xbf16>
      tpu.vector_store %arg8[%c0_70, %c0_71], %225 {strides = array<i32>} : memref<8x128xbf16, #tpu.memory_space<vmem>>, vector<8x128xbf16>,
      %cst_72 = arith.constant 1.000000e+00 : f32
      %227 = vector.broadcast %cst_72 : f32 to vector<8x128xf32>
      %c0_73 = arith.constant 0 : index
      %c0_74 = arith.constant 0 : index
      %228 = vector.load %arg9[%c0_73, %c0_74] : memref<8x128xf32, #tpu.memory_space<vmem>>, vector<8x128xf32>
      tpu.vector_store %arg9[%c0_73, %c0_74], %227 {strides = array<i32>} : memref<8x128xf32, #tpu.memory_space<vmem>>, vector<8x128xf32>,
    } else {
    }
    %c0 = arith.constant 0 : index
    %c0_1 = arith.constant 0 : index
    %c0_2 = arith.constant 0 : index
    %3 = vector.load %arg2[%c0, %c0_1, %c0_2] : memref<8x8x128xbf16, #tpu.memory_space<vmem>>, vector<8x8x128xbf16>
    %4 = vector.shape_cast %3 : vector<8x8x128xbf16> to vector<64x128xbf16>
    %c0_3 = arith.constant 0 : index
    %c0_4 = arith.constant 0 : index
    %5 = vector.load %arg3[%c0_3, %c0_4] : memref<128x512xbf16, #tpu.memory_space<vmem>>, vector<128x512xbf16>
    %cst = arith.constant dense<0.000000e+00> : vector<64x512xf32>
    %6 = tpu.matmul %4, %5, %cst {dimension_numbers = #tpu.dot_dimension_numbers<[1], [0], [0], [1], [0, 0, 1, 1], [], []>} : vector<64x128xbf16>, vector<128x512xbf16>, vector<64x512xf32> -> vector<64x512xf32>
    %c0_5 = arith.constant 0 : index
    %c0_6 = arith.constant 0 : index
    %7 = vector.load %arg5[%c0_5, %c0_6] : memref<1x512xf32, #tpu.memory_space<vmem>>, vector<1x512xf32>
    %8 = vector.broadcast %7 : vector<1x512xf32> to vector<64x512xf32>
    %9 = arith.addf %6, %8 : vector<64x512xf32>
    %10 = vector.shape_cast %9 : vector<64x512xf32> to vector<8x8x512xf32>
    %c0_7 = arith.constant 0 : index
    %c0_8 = arith.constant 0 : index
    %c0_9 = arith.constant 0 : index
    %11 = vector.load %arg7[%c0_7, %c0_8, %c0_9] : memref<8x8x512xf32, #tpu.memory_space<vmem>>, vector<8x8x512xf32>
    tpu.vector_store %arg7[%c0_7, %c0_8, %c0_9], %10 {strides = array<i32>} : memref<8x8x512xf32, #tpu.memory_space<vmem>>, vector<8x8x512xf32>,
    %c0_10 = arith.constant 0 : index
    %c0_11 = arith.constant 0 : index
    %12 = vector.load %arg4[%c0_10, %c0_11] : memref<128x512xbf16, #tpu.memory_space<vmem>>, vector<128x512xbf16>
    %c0_12 = arith.constant 0 : index
    %c0_13 = arith.constant 0 : index
    %13 = vector.load %arg8[%c0_12, %c0_13] : memref<8x128xbf16, #tpu.memory_space<vmem>>, vector<8x128xbf16>
    %c0_14 = arith.constant 0 : index
    %c0_15 = arith.constant 0 : index
    %14 = vector.load %arg9[%c0_14, %c0_15] : memref<8x128xf32, #tpu.memory_space<vmem>>, vector<8x128xf32>
    %c0_i32_16 = arith.constant 0 : i32
    %15 = arith.index_cast %c0_i32_16 : i32 to index
    %c0_17 = arith.constant 0 : index
    %c0_18 = arith.constant 0 : index
    %16 = vector.load %arg7[%15, %c0_17, %c0_18] : memref<8x8x512xf32, #tpu.memory_space<vmem>>, vector<1x8x512xf32>
    %17 = vector.shape_cast %16 : vector<1x8x512xf32> to vector<8x512xf32>
    %cst_19 = arith.constant dense<0.000000e+00> : vector<8x512xf32>
    %18 = tpu.matmul %13, %12, %cst_19 {dimension_numbers = #tpu.dot_dimension_numbers<[1], [0], [0], [1], [0, 0, 1, 1], [], []>} : vector<8x128xbf16>, vector<128x512xbf16>, vector<8x512xf32> -> vector<8x512xf32>
    %19 = arith.addf %17, %18 : vector<8x512xf32>
    %20 = vector.extract_strided_slice %19 {offsets = [0, 0], sizes = [8, 128], strides = [1, 1]} : vector<8x512xf32> to vector<8x128xf32>
    %21 = math.tanh %20 : vector<8x128xf32>
    %22 = vector.extract_strided_slice %19 {offsets = [0, 128], sizes = [8, 384], strides = [1, 1]} : vector<8x512xf32> to vector<8x384xf32>
    %23 = arith.negf %22 : vector<8x384xf32>
    %24 = math.exp %23 : vector<8x384xf32>
    %cst_20 = arith.constant 1.000000e+00 : f32
    %25 = vector.broadcast %cst_20 : f32 to vector<8x384xf32>
    %26 = arith.addf %25, %24 : vector<8x384xf32>
    %27 = arith.divf %25, %26 : vector<8x384xf32>
    %28 = vector.extract_strided_slice %27 {offsets = [0, 0], sizes = [8, 128], strides = [1, 1]} : vector<8x384xf32> to vector<8x128xf32>
    %29 = vector.extract_strided_slice %27 {offsets = [0, 128], sizes = [8, 128], strides = [1, 1]} : vector<8x384xf32> to vector<8x128xf32>
    %30 = vector.extract_strided_slice %27 {offsets = [0, 256], sizes = [8, 128], strides = [1, 1]} : vector<8x384xf32> to vector<8x128xf32>
    %31 = arith.mulf %21, %28 : vector<8x128xf32>
    %32 = arith.mulf %14, %29 : vector<8x128xf32>
    %33 = arith.addf %31, %32 : vector<8x128xf32>
    %34 = math.tanh %33 : vector<8x128xf32>
    %35 = arith.mulf %34, %30 : vector<8x128xf32>
    %36 = arith.index_cast %c0_i32_16 : i32 to index
    %c0_21 = arith.constant 0 : index
    %c0_22 = arith.constant 0 : index
    %37 = vector.load %arg6[%36, %c0_21, %c0_22] : memref<8x8x128xf32, #tpu.memory_space<vmem>>, vector<1x8x128xf32>
    %38 = vector.shape_cast %37 : vector<1x8x128xf32> to vector<8x128xf32>
    %39 = vector.shape_cast %35 : vector<8x128xf32> to vector<1x8x128xf32>
    tpu.vector_store %arg6[%36, %c0_21, %c0_22], %39 {strides = array<i32>} : memref<8x8x128xf32, #tpu.memory_space<vmem>>, vector<1x8x128xf32>,
    %40 = arith.truncf %35 : vector<8x128xf32> to vector<8x128xbf16>
    %c1_i32 = arith.constant 1 : i32
    %41 = arith.index_cast %c1_i32 : i32 to index
    %c0_23 = arith.constant 0 : index
    %c0_24 = arith.constant 0 : index
    %42 = vector.load %arg7[%41, %c0_23, %c0_24] : memref<8x8x512xf32, #tpu.memory_space<vmem>>, vector<1x8x512xf32>
    %43 = vector.shape_cast %42 : vector<1x8x512xf32> to vector<8x512xf32>
    %cst_25 = arith.constant dense<0.000000e+00> : vector<8x512xf32>
    %44 = tpu.matmul %40, %12, %cst_25 {dimension_numbers = #tpu.dot_dimension_numbers<[1], [0], [0], [1], [0, 0, 1, 1], [], []>} : vector<8x128xbf16>, vector<128x512xbf16>, vector<8x512xf32> -> vector<8x512xf32>
    %45 = arith.addf %43, %44 : vector<8x512xf32>
    %46 = vector.extract_strided_slice %45 {offsets = [0, 0], sizes = [8, 128], strides = [1, 1]} : vector<8x512xf32> to vector<8x128xf32>
    %47 = math.tanh %46 : vector<8x128xf32>
    %48 = vector.extract_strided_slice %45 {offsets = [0, 128], sizes = [8, 384], strides = [1, 1]} : vector<8x512xf32> to vector<8x384xf32>
    %49 = arith.negf %48 : vector<8x384xf32>
    %50 = math.exp %49 : vector<8x384xf32>
    %cst_26 = arith.constant 1.000000e+00 : f32
    %51 = vector.broadcast %cst_26 : f32 to vector<8x384xf32>
    %52 = arith.addf %51, %50 : vector<8x384xf32>
    %53 = arith.divf %51, %52 : vector<8x384xf32>
    %54 = vector.extract_strided_slice %53 {offsets = [0, 0], sizes = [8, 128], strides = [1, 1]} : vector<8x384xf32> to vector<8x128xf32>
    %55 = vector.extract_strided_slice %53 {offsets = [0, 128], sizes = [8, 128], strides = [1, 1]} : vector<8x384xf32> to vector<8x128xf32>
    %56 = vector.extract_strided_slice %53 {offsets = [0, 256], sizes = [8, 128], strides = [1, 1]} : vector<8x384xf32> to vector<8x128xf32>
    %57 = arith.mulf %47, %54 : vector<8x128xf32>
    %58 = arith.mulf %33, %55 : vector<8x128xf32>
    %59 = arith.addf %57, %58 : vector<8x128xf32>
    %60 = math.tanh %59 : vector<8x128xf32>
    %61 = arith.mulf %60, %56 : vector<8x128xf32>
    %62 = arith.index_cast %c1_i32 : i32 to index
    %c0_27 = arith.constant 0 : index
    %c0_28 = arith.constant 0 : index
    %63 = vector.load %arg6[%62, %c0_27, %c0_28] : memref<8x8x128xf32, #tpu.memory_space<vmem>>, vector<1x8x128xf32>
    %64 = vector.shape_cast %63 : vector<1x8x128xf32> to vector<8x128xf32>
    %65 = vector.shape_cast %61 : vector<8x128xf32> to vector<1x8x128xf32>
    tpu.vector_store %arg6[%62, %c0_27, %c0_28], %65 {strides = array<i32>} : memref<8x8x128xf32, #tpu.memory_space<vmem>>, vector<1x8x128xf32>,
    %66 = arith.truncf %61 : vector<8x128xf32> to vector<8x128xbf16>
    %c2_i32 = arith.constant 2 : i32
    %67 = arith.index_cast %c2_i32 : i32 to index
    %c0_29 = arith.constant 0 : index
    %c0_30 = arith.constant 0 : index
    %68 = vector.load %arg7[%67, %c0_29, %c0_30] : memref<8x8x512xf32, #tpu.memory_space<vmem>>, vector<1x8x512xf32>
    %69 = vector.shape_cast %68 : vector<1x8x512xf32> to vector<8x512xf32>
    %cst_31 = arith.constant dense<0.000000e+00> : vector<8x512xf32>
    %70 = tpu.matmul %66, %12, %cst_31 {dimension_numbers = #tpu.dot_dimension_numbers<[1], [0], [0], [1], [0, 0, 1, 1], [], []>} : vector<8x128xbf16>, vector<128x512xbf16>, vector<8x512xf32> -> vector<8x512xf32>
    %71 = arith.addf %69, %70 : vector<8x512xf32>
    %72 = vector.extract_strided_slice %71 {offsets = [0, 0], sizes = [8, 128], strides = [1, 1]} : vector<8x512xf32> to vector<8x128xf32>
    %73 = math.tanh %72 : vector<8x128xf32>
    %74 = vector.extract_strided_slice %71 {offsets = [0, 128], sizes = [8, 384], strides = [1, 1]} : vector<8x512xf32> to vector<8x384xf32>
    %75 = arith.negf %74 : vector<8x384xf32>
    %76 = math.exp %75 : vector<8x384xf32>
    %cst_32 = arith.constant 1.000000e+00 : f32
    %77 = vector.broadcast %cst_32 : f32 to vector<8x384xf32>
    %78 = arith.addf %77, %76 : vector<8x384xf32>
    %79 = arith.divf %77, %78 : vector<8x384xf32>
    %80 = vector.extract_strided_slice %79 {offsets = [0, 0], sizes = [8, 128], strides = [1, 1]} : vector<8x384xf32> to vector<8x128xf32>
    %81 = vector.extract_strided_slice %79 {offsets = [0, 128], sizes = [8, 128], strides = [1, 1]} : vector<8x384xf32> to vector<8x128xf32>
    %82 = vector.extract_strided_slice %79 {offsets = [0, 256], sizes = [8, 128], strides = [1, 1]} : vector<8x384xf32> to vector<8x128xf32>
    %83 = arith.mulf %73, %80 : vector<8x128xf32>
    %84 = arith.mulf %59, %81 : vector<8x128xf32>
    %85 = arith.addf %83, %84 : vector<8x128xf32>
    %86 = math.tanh %85 : vector<8x128xf32>
    %87 = arith.mulf %86, %82 : vector<8x128xf32>
    %88 = arith.index_cast %c2_i32 : i32 to index
    %c0_33 = arith.constant 0 : index
    %c0_34 = arith.constant 0 : index
    %89 = vector.load %arg6[%88, %c0_33, %c0_34] : memref<8x8x128xf32, #tpu.memory_space<vmem>>, vector<1x8x128xf32>
    %90 = vector.shape_cast %89 : vector<1x8x128xf32> to vector<8x128xf32>
    %91 = vector.shape_cast %87 : vector<8x128xf32> to vector<1x8x128xf32>
    tpu.vector_store %arg6[%88, %c0_33, %c0_34], %91 {strides = array<i32>} : memref<8x8x128xf32, #tpu.memory_space<vmem>>, vector<1x8x128xf32>,
    %92 = arith.truncf %87 : vector<8x128xf32> to vector<8x128xbf16>
    %c3_i32 = arith.constant 3 : i32
    %93 = arith.index_cast %c3_i32 : i32 to index
    %c0_35 = arith.constant 0 : index
    %c0_36 = arith.constant 0 : index
    %94 = vector.load %arg7[%93, %c0_35, %c0_36] : memref<8x8x512xf32, #tpu.memory_space<vmem>>, vector<1x8x512xf32>
    %95 = vector.shape_cast %94 : vector<1x8x512xf32> to vector<8x512xf32>
    %cst_37 = arith.constant dense<0.000000e+00> : vector<8x512xf32>
    %96 = tpu.matmul %92, %12, %cst_37 {dimension_numbers = #tpu.dot_dimension_numbers<[1], [0], [0], [1], [0, 0, 1, 1], [], []>} : vector<8x128xbf16>, vector<128x512xbf16>, vector<8x512xf32> -> vector<8x512xf32>
    %97 = arith.addf %95, %96 : vector<8x512xf32>
    %98 = vector.extract_strided_slice %97 {offsets = [0, 0], sizes = [8, 128], strides = [1, 1]} : vector<8x512xf32> to vector<8x128xf32>
    %99 = math.tanh %98 : vector<8x128xf32>
    %100 = vector.extract_strided_slice %97 {offsets = [0, 128], sizes = [8, 384], strides = [1, 1]} : vector<8x512xf32> to vector<8x384xf32>
    %101 = arith.negf %100 : vector<8x384xf32>
    %102 = math.exp %101 : vector<8x384xf32>
    %cst_38 = arith.constant 1.000000e+00 : f32
    %103 = vector.broadcast %cst_38 : f32 to vector<8x384xf32>
    %104 = arith.addf %103, %102 : vector<8x384xf32>
    %105 = arith.divf %103, %104 : vector<8x384xf32>
    %106 = vector.extract_strided_slice %105 {offsets = [0, 0], sizes = [8, 128], strides = [1, 1]} : vector<8x384xf32> to vector<8x128xf32>
    %107 = vector.extract_strided_slice %105 {offsets = [0, 128], sizes = [8, 128], strides = [1, 1]} : vector<8x384xf32> to vector<8x128xf32>
    %108 = vector.extract_strided_slice %105 {offsets = [0, 256], sizes = [8, 128], strides = [1, 1]} : vector<8x384xf32> to vector<8x128xf32>
    %109 = arith.mulf %99, %106 : vector<8x128xf32>
    %110 = arith.mulf %85, %107 : vector<8x128xf32>
    %111 = arith.addf %109, %110 : vector<8x128xf32>
    %112 = math.tanh %111 : vector<8x128xf32>
    %113 = arith.mulf %112, %108 : vector<8x128xf32>
    %114 = arith.index_cast %c3_i32 : i32 to index
    %c0_39 = arith.constant 0 : index
    %c0_40 = arith.constant 0 : index
    %115 = vector.load %arg6[%114, %c0_39, %c0_40] : memref<8x8x128xf32, #tpu.memory_space<vmem>>, vector<1x8x128xf32>
    %116 = vector.shape_cast %115 : vector<1x8x128xf32> to vector<8x128xf32>
    %117 = vector.shape_cast %113 : vector<8x128xf32> to vector<1x8x128xf32>
    tpu.vector_store %arg6[%114, %c0_39, %c0_40], %117 {strides = array<i32>} : memref<8x8x128xf32, #tpu.memory_space<vmem>>, vector<1x8x128xf32>,
    %118 = arith.truncf %113 : vector<8x128xf32> to vector<8x128xbf16>
    %c4_i32 = arith.constant 4 : i32
    %119 = arith.index_cast %c4_i32 : i32 to index
    %c0_41 = arith.constant 0 : index
    %c0_42 = arith.constant 0 : index
    %120 = vector.load %arg7[%119, %c0_41, %c0_42] : memref<8x8x512xf32, #tpu.memory_space<vmem>>, vector<1x8x512xf32>
    %121 = vector.shape_cast %120 : vector<1x8x512xf32> to vector<8x512xf32>
    %cst_43 = arith.constant dense<0.000000e+00> : vector<8x512xf32>
    %122 = tpu.matmul %118, %12, %cst_43 {dimension_numbers = #tpu.dot_dimension_numbers<[1], [0], [0], [1], [0, 0, 1, 1], [], []>} : vector<8x128xbf16>, vector<128x512xbf16>, vector<8x512xf32> -> vector<8x512xf32>
    %123 = arith.addf %121, %122 : vector<8x512xf32>
    %124 = vector.extract_strided_slice %123 {offsets = [0, 0], sizes = [8, 128], strides = [1, 1]} : vector<8x512xf32> to vector<8x128xf32>
    %125 = math.tanh %124 : vector<8x128xf32>
    %126 = vector.extract_strided_slice %123 {offsets = [0, 128], sizes = [8, 384], strides = [1, 1]} : vector<8x512xf32> to vector<8x384xf32>
    %127 = arith.negf %126 : vector<8x384xf32>
    %128 = math.exp %127 : vector<8x384xf32>
    %cst_44 = arith.constant 1.000000e+00 : f32
    %129 = vector.broadcast %cst_44 : f32 to vector<8x384xf32>
    %130 = arith.addf %129, %128 : vector<8x384xf32>
    %131 = arith.divf %129, %130 : vector<8x384xf32>
    %132 = vector.extract_strided_slice %131 {offsets = [0, 0], sizes = [8, 128], strides = [1, 1]} : vector<8x384xf32> to vector<8x128xf32>
    %133 = vector.extract_strided_slice %131 {offsets = [0, 128], sizes = [8, 128], strides = [1, 1]} : vector<8x384xf32> to vector<8x128xf32>
    %134 = vector.extract_strided_slice %131 {offsets = [0, 256], sizes = [8, 128], strides = [1, 1]} : vector<8x384xf32> to vector<8x128xf32>
    %135 = arith.mulf %125, %132 : vector<8x128xf32>
    %136 = arith.mulf %111, %133 : vector<8x128xf32>
    %137 = arith.addf %135, %136 : vector<8x128xf32>
    %138 = math.tanh %137 : vector<8x128xf32>
    %139 = arith.mulf %138, %134 : vector<8x128xf32>
    %140 = arith.index_cast %c4_i32 : i32 to index
    %c0_45 = arith.constant 0 : index
    %c0_46 = arith.constant 0 : index
    %141 = vector.load %arg6[%140, %c0_45, %c0_46] : memref<8x8x128xf32, #tpu.memory_space<vmem>>, vector<1x8x128xf32>
    %142 = vector.shape_cast %141 : vector<1x8x128xf32> to vector<8x128xf32>
    %143 = vector.shape_cast %139 : vector<8x128xf32> to vector<1x8x128xf32>
    tpu.vector_store %arg6[%140, %c0_45, %c0_46], %143 {strides = array<i32>} : memref<8x8x128xf32, #tpu.memory_space<vmem>>, vector<1x8x128xf32>,
    %144 = arith.truncf %139 : vector<8x128xf32> to vector<8x128xbf16>
    %c5_i32 = arith.constant 5 : i32
    %145 = arith.index_cast %c5_i32 : i32 to index
    %c0_47 = arith.constant 0 : index
    %c0_48 = arith.constant 0 : index
    %146 = vector.load %arg7[%145, %c0_47, %c0_48] : memref<8x8x512xf32, #tpu.memory_space<vmem>>, vector<1x8x512xf32>
    %147 = vector.shape_cast %146 : vector<1x8x512xf32> to vector<8x512xf32>
    %cst_49 = arith.constant dense<0.000000e+00> : vector<8x512xf32>
    %148 = tpu.matmul %144, %12, %cst_49 {dimension_numbers = #tpu.dot_dimension_numbers<[1], [0], [0], [1], [0, 0, 1, 1], [], []>} : vector<8x128xbf16>, vector<128x512xbf16>, vector<8x512xf32> -> vector<8x512xf32>
    %149 = arith.addf %147, %148 : vector<8x512xf32>
    %150 = vector.extract_strided_slice %149 {offsets = [0, 0], sizes = [8, 128], strides = [1, 1]} : vector<8x512xf32> to vector<8x128xf32>
    %151 = math.tanh %150 : vector<8x128xf32>
    %152 = vector.extract_strided_slice %149 {offsets = [0, 128], sizes = [8, 384], strides = [1, 1]} : vector<8x512xf32> to vector<8x384xf32>
    %153 = arith.negf %152 : vector<8x384xf32>
    %154 = math.exp %153 : vector<8x384xf32>
    %cst_50 = arith.constant 1.000000e+00 : f32
    %155 = vector.broadcast %cst_50 : f32 to vector<8x384xf32>
    %156 = arith.addf %155, %154 : vector<8x384xf32>
    %157 = arith.divf %155, %156 : vector<8x384xf32>
    %158 = vector.extract_strided_slice %157 {offsets = [0, 0], sizes = [8, 128], strides = [1, 1]} : vector<8x384xf32> to vector<8x128xf32>
    %159 = vector.extract_strided_slice %157 {offsets = [0, 128], sizes = [8, 128], strides = [1, 1]} : vector<8x384xf32> to vector<8x128xf32>
    %160 = vector.extract_strided_slice %157 {offsets = [0, 256], sizes = [8, 128], strides = [1, 1]} : vector<8x384xf32> to vector<8x128xf32>
    %161 = arith.mulf %151, %158 : vector<8x128xf32>
    %162 = arith.mulf %137, %159 : vector<8x128xf32>
    %163 = arith.addf %161, %162 : vector<8x128xf32>
    %164 = math.tanh %163 : vector<8x128xf32>
    %165 = arith.mulf %164, %160 : vector<8x128xf32>
    %166 = arith.index_cast %c5_i32 : i32 to index
    %c0_51 = arith.constant 0 : index
    %c0_52 = arith.constant 0 : index
    %167 = vector.load %arg6[%166, %c0_51, %c0_52] : memref<8x8x128xf32, #tpu.memory_space<vmem>>, vector<1x8x128xf32>
    %168 = vector.shape_cast %167 : vector<1x8x128xf32> to vector<8x128xf32>
    %169 = vector.shape_cast %165 : vector<8x128xf32> to vector<1x8x128xf32>
    tpu.vector_store %arg6[%166, %c0_51, %c0_52], %169 {strides = array<i32>} : memref<8x8x128xf32, #tpu.memory_space<vmem>>, vector<1x8x128xf32>,
    %170 = arith.truncf %165 : vector<8x128xf32> to vector<8x128xbf16>
    %c6_i32 = arith.constant 6 : i32
    %171 = arith.index_cast %c6_i32 : i32 to index
    %c0_53 = arith.constant 0 : index
    %c0_54 = arith.constant 0 : index
    %172 = vector.load %arg7[%171, %c0_53, %c0_54] : memref<8x8x512xf32, #tpu.memory_space<vmem>>, vector<1x8x512xf32>
    %173 = vector.shape_cast %172 : vector<1x8x512xf32> to vector<8x512xf32>
    %cst_55 = arith.constant dense<0.000000e+00> : vector<8x512xf32>
    %174 = tpu.matmul %170, %12, %cst_55 {dimension_numbers = #tpu.dot_dimension_numbers<[1], [0], [0], [1], [0, 0, 1, 1], [], []>} : vector<8x128xbf16>, vector<128x512xbf16>, vector<8x512xf32> -> vector<8x512xf32>
    %175 = arith.addf %173, %174 : vector<8x512xf32>
    %176 = vector.extract_strided_slice %175 {offsets = [0, 0], sizes = [8, 128], strides = [1, 1]} : vector<8x512xf32> to vector<8x128xf32>
    %177 = math.tanh %176 : vector<8x128xf32>
    %178 = vector.extract_strided_slice %175 {offsets = [0, 128], sizes = [8, 384], strides = [1, 1]} : vector<8x512xf32> to vector<8x384xf32>
    %179 = arith.negf %178 : vector<8x384xf32>
    %180 = math.exp %179 : vector<8x384xf32>
    %cst_56 = arith.constant 1.000000e+00 : f32
    %181 = vector.broadcast %cst_56 : f32 to vector<8x384xf32>
    %182 = arith.addf %181, %180 : vector<8x384xf32>
    %183 = arith.divf %181, %182 : vector<8x384xf32>
    %184 = vector.extract_strided_slice %183 {offsets = [0, 0], sizes = [8, 128], strides = [1, 1]} : vector<8x384xf32> to vector<8x128xf32>
    %185 = vector.extract_strided_slice %183 {offsets = [0, 128], sizes = [8, 128], strides = [1, 1]} : vector<8x384xf32> to vector<8x128xf32>
    %186 = vector.extract_strided_slice %183 {offsets = [0, 256], sizes = [8, 128], strides = [1, 1]} : vector<8x384xf32> to vector<8x128xf32>
    %187 = arith.mulf %177, %184 : vector<8x128xf32>
    %188 = arith.mulf %163, %185 : vector<8x128xf32>
    %189 = arith.addf %187, %188 : vector<8x128xf32>
    %190 = math.tanh %189 : vector<8x128xf32>
    %191 = arith.mulf %190, %186 : vector<8x128xf32>
    %192 = arith.index_cast %c6_i32 : i32 to index
    %c0_57 = arith.constant 0 : index
    %c0_58 = arith.constant 0 : index
    %193 = vector.load %arg6[%192, %c0_57, %c0_58] : memref<8x8x128xf32, #tpu.memory_space<vmem>>, vector<1x8x128xf32>
    %194 = vector.shape_cast %193 : vector<1x8x128xf32> to vector<8x128xf32>
    %195 = vector.shape_cast %191 : vector<8x128xf32> to vector<1x8x128xf32>
    tpu.vector_store %arg6[%192, %c0_57, %c0_58], %195 {strides = array<i32>} : memref<8x8x128xf32, #tpu.memory_space<vmem>>, vector<1x8x128xf32>,
    %196 = arith.truncf %191 : vector<8x128xf32> to vector<8x128xbf16>
    %c7_i32 = arith.constant 7 : i32
    %197 = arith.index_cast %c7_i32 : i32 to index
    %c0_59 = arith.constant 0 : index
    %c0_60 = arith.constant 0 : index
    %198 = vector.load %arg7[%197, %c0_59, %c0_60] : memref<8x8x512xf32, #tpu.memory_space<vmem>>, vector<1x8x512xf32>
    %199 = vector.shape_cast %198 : vector<1x8x512xf32> to vector<8x512xf32>
    %cst_61 = arith.constant dense<0.000000e+00> : vector<8x512xf32>
    %200 = tpu.matmul %196, %12, %cst_61 {dimension_numbers = #tpu.dot_dimension_numbers<[1], [0], [0], [1], [0, 0, 1, 1], [], []>} : vector<8x128xbf16>, vector<128x512xbf16>, vector<8x512xf32> -> vector<8x512xf32>
    %201 = arith.addf %199, %200 : vector<8x512xf32>
    %202 = vector.extract_strided_slice %201 {offsets = [0, 0], sizes = [8, 128], strides = [1, 1]} : vector<8x512xf32> to vector<8x128xf32>
    %203 = math.tanh %202 : vector<8x128xf32>
    %204 = vector.extract_strided_slice %201 {offsets = [0, 128], sizes = [8, 384], strides = [1, 1]} : vector<8x512xf32> to vector<8x384xf32>
    %205 = arith.negf %204 : vector<8x384xf32>
    %206 = math.exp %205 : vector<8x384xf32>
    %cst_62 = arith.constant 1.000000e+00 : f32
    %207 = vector.broadcast %cst_62 : f32 to vector<8x384xf32>
    %208 = arith.addf %207, %206 : vector<8x384xf32>
    %209 = arith.divf %207, %208 : vector<8x384xf32>
    %210 = vector.extract_strided_slice %209 {offsets = [0, 0], sizes = [8, 128], strides = [1, 1]} : vector<8x384xf32> to vector<8x128xf32>
    %211 = vector.extract_strided_slice %209 {offsets = [0, 128], sizes = [8, 128], strides = [1, 1]} : vector<8x384xf32> to vector<8x128xf32>
    %212 = vector.extract_strided_slice %209 {offsets = [0, 256], sizes = [8, 128], strides = [1, 1]} : vector<8x384xf32> to vector<8x128xf32>
    %213 = arith.mulf %203, %210 : vector<8x128xf32>
    %214 = arith.mulf %189, %211 : vector<8x128xf32>
    %215 = arith.addf %213, %214 : vector<8x128xf32>
    %216 = math.tanh %215 : vector<8x128xf32>
    %217 = arith.mulf %216, %212 : vector<8x128xf32>
    %218 = arith.index_cast %c7_i32 : i32 to index
    %c0_63 = arith.constant 0 : index
    %c0_64 = arith.constant 0 : index
    %219 = vector.load %arg6[%218, %c0_63, %c0_64] : memref<8x8x128xf32, #tpu.memory_space<vmem>>, vector<1x8x128xf32>
    %220 = vector.shape_cast %219 : vector<1x8x128xf32> to vector<8x128xf32>
    %221 = vector.shape_cast %217 : vector<8x128xf32> to vector<1x8x128xf32>
    tpu.vector_store %arg6[%218, %c0_63, %c0_64], %221 {strides = array<i32>} : memref<8x8x128xf32, #tpu.memory_space<vmem>>, vector<1x8x128xf32>,
    %222 = arith.truncf %217 : vector<8x128xf32> to vector<8x128xbf16>
    %c8_i32 = arith.constant 8 : i32
    %c0_65 = arith.constant 0 : index
    %c0_66 = arith.constant 0 : index
    %223 = vector.load %arg8[%c0_65, %c0_66] : memref<8x128xbf16, #tpu.memory_space<vmem>>, vector<8x128xbf16>
    tpu.vector_store %arg8[%c0_65, %c0_66], %222 {strides = array<i32>} : memref<8x128xbf16, #tpu.memory_space<vmem>>, vector<8x128xbf16>,
    %c0_67 = arith.constant 0 : index
    %c0_68 = arith.constant 0 : index
    %224 = vector.load %arg9[%c0_67, %c0_68] : memref<8x128xf32, #tpu.memory_space<vmem>>, vector<8x128xf32>
    tpu.vector_store %arg9[%c0_67, %c0_68], %215 {strides = array<i32>} : memref<8x128xf32, #tpu.memory_space<vmem>>, vector<8x128xf32>,
    return
  }
  func.func @transform_0(%arg0: i32, %arg1: i32) -> (i32, i32, i32) {
    %c0_i32 = arith.constant 0 : i32
    %c0_i32_0 = arith.constant 0 : i32
    return %arg1, %arg0, %c0_i32 : i32, i32, i32
  }
  func.func @transform_1(%arg0: i32, %arg1: i32) -> (i32, i32) {
    %c0_i32 = arith.constant 0 : i32
    %c0_i32_0 = arith.constant 0 : i32
    %c0_i32_1 = arith.constant 0 : i32
    return %c0_i32, %c0_i32_0 : i32, i32
  }
  func.func @transform_2(%arg0: i32, %arg1: i32) -> (i32, i32) {
    %c0_i32 = arith.constant 0 : i32
    %c0_i32_0 = arith.constant 0 : i32
    %c0_i32_1 = arith.constant 0 : i32
    return %c0_i32, %c0_i32_0 : i32, i32
  }
  func.func @transform_3(%arg0: i32, %arg1: i32) -> (i32, i32) {
    %c0_i32 = arith.constant 0 : i32
    %c0_i32_0 = arith.constant 0 : i32
    %c0_i32_1 = arith.constant 0 : i32
    return %c0_i32, %c0_i32_0 : i32, i32
  }
  func.func @transform_4(%arg0: i32, %arg1: i32) -> (i32, i32, i32) {
    %c0_i32 = arith.constant 0 : i32
    %c0_i32_0 = arith.constant 0 : i32
    return %arg1, %arg0, %c0_i32 : i32, i32, i32
  }
}

</mosaic_0001>

<bundles_post_ra>
// kernel: lstm_forward.1
= control target key start
LH: loop header
LB: loop body
LE: loop exit
PB: predicated region body
PF: predicated region fallthrough
CT: control target
= control target key end

     0   :  { %9 = vsyncpa [#allocation6], 0  ;;  %s2662_s0 = inlined_call_operand.vmem [shape: bf16[8,8,128], index: 0, kind: input, shape index: {}]   ;;  %s2663_s1 = inlined_call_operand.hbm [shape: bf16[128,512], index: 1, kind: input, shape index: {}]   ;;  %s2664_s2 = inlined_call_operand.hbm [shape: bf16[128,512], index: 2, kind: input, shape index: {}]   ;;  %s2665_s3 = inlined_call_operand.vmem [shape: f32[1,512], index: 3, kind: input, shape index: {}]   ;;  %s2666_s4 = inlined_call_operand.hbm [shape: f32[8,8,128], index: 4, kind: output, shape index: {}]  }
   0x1   :  { %10 = vsyncpa [#allocation9], 0 }
   0x2   :  { %11 = vsyncpa [#allocation7], 0  ;;  %s2065_s15 = smov [#allocation5]   ;;  %s1993_s19 = scalar_lea.hbm %s2663_s1, 4096 }
   0x3   :  { %s19_s16 = sshll.u32 %s2065_s15, 4  ;;  %p1994_p0 = scmp.ne.s32.totalorder %s2663_s1, %s1993_s19  ;;  %s20_s16 = int_to_ptr.vmem [resolvable:$true] %s19_s16 }
   0x4   :  { %p1997_p1 = scmp.lt.u32.totalorder %s1993_s19, %s2663_s1 }
   0x6   :  { %p1999_p2 = pnand %p1997_p1, %p1994_p0 }
   0x8   :  { %2002 = shalt.err (!%p1999_p2)
}
   0x9   :  { %s2003_s24 = scalar_lea.vmem %s20_s16, 4096  ;;  %p2008_p4 = scmp.lt.s32.totalorder %s20_s16, %s20_s16 }
   0xa   :  { %p2004_p3 = scmp.ne.s32.totalorder %s20_s16, %s2003_s24  ;;  %p2009_p5 = scmp.lt.s32.totalorder %s2003_s24, %s2003_s24 }
   0xc   :  { %p2010_p6 = por %p2009_p5, %p2008_p4 }
   0xe   :  { %p2011_p7 = pnand %p2010_p6, %p2004_p3 }
  0x10   :  { %2014 = shalt.err (!%p2011_p7)
}
  0x11   :  { %s2066_s25 = smov 256   ;;  %s2067_s26 = smov 16  }
  0x12   :  { %25 = dma.hbm_to_vmem [thread:$0]  %s2663_s1, 4096, %s20_s16, [#allocation6], %s2066_s25, %s2066_s25, %s2067_s26  }
  0x13   :  { %s2068_s29 = smov [#allocation8]   ;;  %s2015_s7 = scalar_lea.hbm %s2664_s2, 4096 }
  0x14   :  { %s31_s30 = sshll.u32 %s2068_s29, 4  ;;  %p2016_p8 = scmp.ne.s32.totalorder %s2664_s2, %s2015_s7  ;;  %s32_s30 = int_to_ptr.vmem [resolvable:$true] %s31_s30 }
  0x15   :  { %p2019_p9 = scmp.lt.u32.totalorder %s2015_s7, %s2664_s2 }
  0x17   :  { %p2021_p10 = pnand %p2019_p9, %p2016_p8 }
  0x19   :  { %2024 = shalt.err (!%p2021_p10)
}
  0x1a   :  { %s2025_s12 = scalar_lea.vmem %s32_s30, 4096  ;;  %p2030_p12 = scmp.lt.s32.totalorder %s32_s30, %s32_s30 }
  0x1b   :  { %p2026_p11 = scmp.ne.s32.totalorder %s32_s30, %s2025_s12  ;;  %p2031_p13 = scmp.lt.s32.totalorder %s2025_s12, %s2025_s12 }
  0x1d   :  { %p2032_p0 = por %p2031_p13, %p2030_p12 }
  0x1f   :  { %p2033_p1 = pnand %p2032_p0, %p2026_p11 }
  0x21   :  { %2036 = shalt.err (!%p2033_p1)
}
  0x22   :  { %37 = dma.hbm_to_vmem [thread:$0]  %s2664_s2, 4096, %s32_s30, [#allocation9], %s2066_s25, %s2066_s25, %s2067_s26  }
  0x23   :  { %2059 = dma.done.wait [#allocation6], 4096  }
  0x24   :  { %2060 = vsyncadd [#allocation6], 4294963200 }
  0x25   :  { %2061 = dma.done.wait [#allocation9], 4096  }
  0x26   :  { %2062 = vsyncadd [#allocation9], 4294963200  ;;  %v2667_v0 = vmov 0   ;;  %v1733_v1 = vld [vmem:[#allocation5 + $0x4] ss:$16 sps:$4 sm:$0xff]   ;;  %v1781_v35 = vld [vmem:[%s2662_s0] sm:$0xff]  }
  0x27   :  { %331 = vmatprep.mubr.bf16.mxu0 %v2667_v0  ;;  %51 = vst [vmem:[#allocation3] sm:$0xf] %v2667_v0  ;;  %404 = vmatprep.mubr.bf16.mxu1 %v2667_v0  ;;  %v1735_v2 = vld [vmem:[#allocation5 + $0xc] ss:$16 sps:$4 sm:$0xff]   ;;  %v1737_v3 = vld [vmem:[#allocation5] ss:$16 sps:$4 sm:$0xff]  }
  0x28   :  { %299 = vmatprep.subr.bf16.mxu0 %v1733_v1  ;;  %v1738_v4 = vld [vmem:[#allocation5 + $0x8] ss:$16 sps:$4 sm:$0xff]   ;;  %372 = vmatprep.subr.bf16.mxu1 %v1735_v2  ;;  %v1739_v5 = vld [vmem:[#allocation5 + $0x24] ss:$16 sps:$4 sm:$0xff]   ;;  %v1741_v6 = vld [vmem:[#allocation5 + $0x2c] ss:$16 sps:$4 sm:$0xff]  }
  0x29   :  { %300 = vmatpush1.bf16.msra.mxu0 %v1737_v3  ;;  %373 = vmatpush1.bf16.msra.mxu1 %v1738_v4  ;;  %v1743_v7 = vld [vmem:[#allocation5 + $0x20] ss:$16 sps:$4 sm:$0xff]   ;;  %v1744_v8 = vld [vmem:[#allocation5 + $0x28] ss:$16 sps:$4 sm:$0xff]   ;;  %v1745_v9 = vld [vmem:[#allocation5 + $0x44] ss:$16 sps:$4 sm:$0xff]  }
  0x2a   :  { %301 = vmatprep.subr.bf16.mxu0 %v1739_v5  ;;  %374 = vmatprep.subr.bf16.mxu1 %v1741_v6  ;;  %v1747_v10 = vld [vmem:[#allocation5 + $0x4c] ss:$16 sps:$4 sm:$0xff]   ;;  %v1749_v11 = vld [vmem:[#allocation5 + $0x40] ss:$16 sps:$4 sm:$0xff]   ;;  %v1750_v12 = vld [vmem:[#allocation5 + $0x48] ss:$16 sps:$4 sm:$0xff]  }
  0x2b   :  { %v1751_v13 = vld [vmem:[#allocation5 + $0x64] ss:$16 sps:$4 sm:$0xff]   ;;  %v1753_v14 = vld [vmem:[#allocation5 + $0x6c] ss:$16 sps:$4 sm:$0xff]   ;;  %v1755_v15 = vld [vmem:[#allocation5 + $0x60] ss:$16 sps:$4 sm:$0xff]  }
  0x2c   :  { %v1756_v16 = vld [vmem:[#allocation5 + $0x68] ss:$16 sps:$4 sm:$0xff]   ;;  %v1757_v17 = vld [vmem:[#allocation5 + $0x84] ss:$16 sps:$4 sm:$0xff]   ;;  %v1759_v18 = vld [vmem:[#allocation5 + $0x8c] ss:$16 sps:$4 sm:$0xff]  }
  0x2d   :  { %302 = vmatpush1.bf16.msra.mxu0 %v1743_v7  ;;  %375 = vmatpush1.bf16.msra.mxu1 %v1744_v8  ;;  %v1761_v19 = vld [vmem:[#allocation5 + $0x80] ss:$16 sps:$4 sm:$0xff]   ;;  %v1762_v20 = vld [vmem:[#allocation5 + $0x88] ss:$16 sps:$4 sm:$0xff]   ;;  %v1763_v21 = vld [vmem:[#allocation5 + $0xa4] ss:$16 sps:$4 sm:$0xff]   ;;  %v95_v7 = vlaneseq }
  0x2e   :  { %303 = vmatprep.subr.bf16.mxu0 %v1745_v9  ;;  %376 = vmatprep.subr.bf16.mxu1 %v1747_v10  ;;  %v1765_v22 = vld [vmem:[#allocation5 + $0xac] ss:$16 sps:$4 sm:$0xff]   ;;  %v1767_v23 = vld [vmem:[#allocation5 + $0xa0] ss:$16 sps:$4 sm:$0xff]   ;;  %v1768_v24 = vld [vmem:[#allocation5 + $0xa8] ss:$16 sps:$4 sm:$0xff]  }
  0x2f   :  { %v1769_v25 = vld [vmem:[#allocation5 + $0xc4] ss:$16 sps:$4 sm:$0xff]   ;;  %v1771_v26 = vld [vmem:[#allocation5 + $0xcc] ss:$16 sps:$4 sm:$0xff]   ;;  %v1773_v27 = vld [vmem:[#allocation5 + $0xc0] ss:$16 sps:$4 sm:$0xff]  }
  0x30   :  { %v1774_v28 = vld [vmem:[#allocation5 + $0xc8] ss:$16 sps:$4 sm:$0xff]   ;;  %v1775_v29 = vld [vmem:[#allocation5 + $0xe4] ss:$16 sps:$4 sm:$0xff]   ;;  %v1777_v30 = vld [vmem:[#allocation5 + $0xec] ss:$16 sps:$4 sm:$0xff]  }
  0x31   :  { %304 = vmatpush1.bf16.msra.mxu0 %v1749_v11  ;;  %377 = vmatpush1.bf16.msra.mxu1 %v1750_v12  ;;  %v1779_v31 = vld [vmem:[#allocation5 + $0xe0] ss:$16 sps:$4 sm:$0xff]   ;;  %v1780_v32 = vld [vmem:[#allocation5 + $0xe8] ss:$16 sps:$4 sm:$0xff]   ;;  %v2125_v33 = vld [vmem:[#allocation8 + $0x4] ss:$16 sps:$4 sm:$0xff]  }
  0x32   :  { %305 = vmatprep.subr.bf16.mxu0 %v1751_v13  ;;  %378 = vmatprep.subr.bf16.mxu1 %v1753_v14  ;;  %v2127_v34 = vld [vmem:[#allocation8 + $0xc] ss:$16 sps:$4 sm:$0xff]   ;;  %v2132_v36 = vld [vmem:[#allocation8] ss:$16 sps:$4 sm:$0xff]   ;;  %v2134_v37 = vld [vmem:[#allocation8 + $0x8] ss:$16 sps:$4 sm:$0xff]  }
  0x33   :  { %v2138_v38 = vld [vmem:[#allocation8 + $0x24] ss:$16 sps:$4 sm:$0xff]   ;;  %v2140_v39 = vld [vmem:[#allocation8 + $0x2c] ss:$16 sps:$4 sm:$0xff]   ;;  %v2142_v40 = vld [vmem:[#allocation8 + $0x20] ss:$16 sps:$4 sm:$0xff]  }
  0x34   :  { %v2146_v41 = vld [vmem:[#allocation8 + $0x28] ss:$16 sps:$4 sm:$0xff]   ;;  %v2150_v42 = vld [vmem:[#allocation8 + $0x44] ss:$16 sps:$4 sm:$0xff]   ;;  %v2152_v43 = vld [vmem:[#allocation8 + $0x4c] ss:$16 sps:$4 sm:$0xff]  }
  0x35   :  { %306 = vmatpush1.bf16.msra.mxu0 %v1755_v15  ;;  %379 = vmatpush1.bf16.msra.mxu1 %v1756_v16  ;;  %v1794_v44 = vld [vmem:[%s2662_s0 + $0x8] sm:$0xff]   ;;  %v2159_v45 = vld [vmem:[#allocation8 + $0x40] ss:$16 sps:$4 sm:$0xff]   ;;  %v2169_v48 = vld [vmem:[#allocation8 + $0x6c] ss:$16 sps:$4 sm:$0xff]   ;;  %v96_v8 = vshrl.u32 %v95_v7, 7 }
  0x36   :  { %307 = vmatprep.subr.bf16.mxu0 %v1757_v17  ;;  %380 = vmatprep.subr.bf16.mxu1 %v1759_v18  ;;  %v2161_v46 = vld [vmem:[#allocation8 + $0x48] ss:$16 sps:$4 sm:$0xff]   ;;  %v2165_v47 = vld [vmem:[#allocation8 + $0x64] ss:$16 sps:$4 sm:$0xff]   ;;  %v2171_v49 = vld [vmem:[#allocation8 + $0x60] ss:$16 sps:$4 sm:$0xff]  }
  0x37   :  { %v2173_v50 = vld [vmem:[#allocation8 + $0x68] ss:$16 sps:$4 sm:$0xff]   ;;  %v2177_v51 = vld [vmem:[#allocation8 + $0x84] ss:$16 sps:$4 sm:$0xff]   ;;  %v2181_v52 = vld [vmem:[#allocation8 + $0x8c] ss:$16 sps:$4 sm:$0xff]  }
  0x38   :  { %v1807_v53 = vld [vmem:[%s2662_s0 + $0x10] sm:$0xff]   ;;  %v2192_v55 = vld [vmem:[#allocation8 + $0x88] ss:$16 sps:$4 sm:$0xff]   ;;  %v2196_v56 = vld [vmem:[#allocation8 + $0xa4] ss:$16 sps:$4 sm:$0xff]   ;;  %v105_v9 = vsub.s32 2, %v96_v8 }
  0x39   :  { %308 = vmatpush1.bf16.msra.mxu0 %v1761_v19  ;;  %381 = vmatpush1.bf16.msra.mxu1 %v1762_v20  ;;  %v2190_v54 = vld [vmem:[#allocation8 + $0x80] ss:$16 sps:$4 sm:$0xff]   ;;  %v2198_v57 = vld [vmem:[#allocation8 + $0xac] ss:$16 sps:$4 sm:$0xff]   ;;  %v2204_v59 = vld [vmem:[#allocation8 + $0xa8] ss:$16 sps:$4 sm:$0xff]  }
  0x3a   :  { %309 = vmatprep.subr.bf16.mxu0 %v1763_v21  ;;  %382 = vmatprep.subr.bf16.mxu1 %v1765_v22  ;;  %v2202_v58 = vld [vmem:[#allocation8 + $0xa0] ss:$16 sps:$4 sm:$0xff]   ;;  %v2208_v60 = vld [vmem:[#allocation8 + $0xc4] ss:$16 sps:$4 sm:$0xff]   ;;  %v2210_v61 = vld [vmem:[#allocation8 + $0xcc] ss:$16 sps:$4 sm:$0xff]  }
  0x3b   :  { %v1820_v62 = vld [vmem:[%s2662_s0 + $0x18] sm:$0xff]   ;;  %v2219_v63 = vld [vmem:[#allocation8 + $0xc0] ss:$16 sps:$4 sm:$0xff]   ;;  %v2227_v3 = vld [vmem:[#allocation8 + $0xec] ss:$16 sps:$4 sm:$0xff]   ;;  %v109_v10 = vsub.s32 3, %v96_v8 }
  0x3c   :  { %v2221_v1 = vld [vmem:[#allocation8 + $0xc8] ss:$16 sps:$4 sm:$0xff]   ;;  %v2225_v2 = vld [vmem:[#allocation8 + $0xe4] ss:$16 sps:$4 sm:$0xff]   ;;  %v2231_v4 = vld [vmem:[#allocation8 + $0xe0] ss:$16 sps:$4 sm:$0xff]  }
  0x3d   :  { %310 = vmatpush1.bf16.msra.mxu0 %v1767_v23  ;;  %383 = vmatpush1.bf16.msra.mxu1 %v1768_v24  ;;  %v2233_v5 = vld [vmem:[#allocation8 + $0xe8] ss:$16 sps:$4 sm:$0xff]   ;;  %v509_v6 = vld [vmem:[#allocation3] sm:$0xf]  ;;  %v97_v11 = vsub.s32 0, %v96_v8  ;;  %v101_v13 = vsub.s32 1, %v96_v8 }
  0x3e   :  { %311 = vmatprep.subr.bf16.mxu0 %v1769_v25  ;;  %384 = vmatprep.subr.bf16.mxu1 %v1771_v26  ;;  %v93_v12 = vld [vmem:[%s2665_s3] sm:$0xf]  ;;  %s2070_s3 = smov [#allocation10]  }
  0x3f   :  { %v2280_v14 = vrot.slane %v93_v12, %v105_v9  ;;  %v2286_v17 = vrot.slane %v93_v12, %v109_v10  ;;  %v98_v18 = vrot.slane %v93_v12, %v97_v11  ;;  %v102_v21 = vrot.slane %v93_v12, %v101_v13  ;;  %s1620_s22 = sshll.u32 %s2070_s3, 4  ;;  %s1621_s22 = int_to_ptr.vmem [resolvable:$true] %s1620_s22 }
  0x40   :  { %s2037_s23 = scalar_lea.vmem %s1621_s22, 1024  ;;  %p2042_p3 = scmp.lt.s32.totalorder %s1621_s22, %s1621_s22 }
  0x41   :  { %312 = vmatpush1.bf16.msra.mxu0 %v1773_v27  ;;  %385 = vmatpush1.bf16.msra.mxu1 %v1774_v28  ;;  %p2038_p2 = scmp.ne.s32.totalorder %s1621_s22, %s2037_s23  ;;  %p2043_p4 = scmp.lt.s32.totalorder %s2037_s23, %s2037_s23 }
  0x42   :  { %313 = vmatprep.subr.bf16.mxu0 %v1775_v29  ;;  %386 = vmatprep.subr.bf16.mxu1 %v1777_v30 }
  0x43   :  { %p2044_p5 = por %p2043_p4, %p2042_p3 }
  0x45   :  { %314 = vmatpush1.bf16.msra.mxu0 %v1779_v31  ;;  %387 = vmatpush1.bf16.msra.mxu1 %v1780_v32  ;;  %p2045_p6 = pnand %p2044_p5, %p2038_p2 }
  0x46   :  { %675 = vmatprep.subr.bf16.mxu0 %v2125_v33  ;;  %716 = vmatprep.subr.bf16.mxu1 %v2127_v34 }
  0x48   :  { %332 = vmatmul.mubr.bf16.vlgmr.msra.gmra.mrb[0].mxu0 %v1781_v35  ;;  %405 = vmatmul.mubr.bf16.vlgmr.msra.gmra.mrb[0].mxu1 %v1781_v35 }
  0x49   :  { %676 = vmatpush1.bf16.msra.mxu0 %v2132_v36  ;;  %717 = vmatpush1.bf16.msra.mxu1 %v2134_v37 }
  0x4a   :  { %677 = vmatprep.subr.bf16.mxu0 %v2138_v38  ;;  %718 = vmatprep.subr.bf16.mxu1 %v2140_v39 }
  0x4b   :  { %341 = vmatprep.mubr.bf16.mxu0 %v2667_v0  ;;  %414 = vmatprep.mubr.bf16.mxu1 %v2667_v0 }
  0x4d   :  { %678 = vmatpush1.bf16.msra.mxu0 %v2142_v40  ;;  %719 = vmatpush1.bf16.msra.mxu1 %v2146_v41 }
  0x4e   :  { %679 = vmatprep.subr.bf16.mxu0 %v2150_v42  ;;  %720 = vmatprep.subr.bf16.mxu1 %v2152_v43 }
  0x50   :  { %342 = vmatmul.mubr.bf16.gmra.mrb[4].mxu0 %v1794_v44  ;;  %415 = vmatmul.mubr.bf16.gmra.mrb[4].mxu1 %v1794_v44 }
  0x51   :  { %680 = vmatpush1.bf16.msra.mxu0 %v2159_v45  ;;  %721 = vmatpush1.bf16.msra.mxu1 %v2161_v46 }
  0x52   :  { %681 = vmatprep.subr.bf16.mxu0 %v2165_v47  ;;  %722 = vmatprep.subr.bf16.mxu1 %v2169_v48 }
  0x53   :  { %351 = vmatprep.mubr.bf16.mxu0 %v2667_v0  ;;  %424 = vmatprep.mubr.bf16.mxu1 %v2667_v0 }
  0x55   :  { %682 = vmatpush1.bf16.msra.mxu0 %v2171_v49  ;;  %723 = vmatpush1.bf16.msra.mxu1 %v2173_v50 }
  0x56   :  { %683 = vmatprep.subr.bf16.mxu0 %v2177_v51  ;;  %724 = vmatprep.subr.bf16.mxu1 %v2181_v52 }
  0x58   :  { %352 = vmatmul.mubr.bf16.gmra.mrb[8].mxu0 %v1807_v53  ;;  %425 = vmatmul.mubr.bf16.gmra.mrb[8].mxu1 %v1807_v53 }
  0x59   :  { %684 = vmatpush1.bf16.msra.mxu0 %v2190_v54  ;;  %725 = vmatpush1.bf16.msra.mxu1 %v2192_v55 }
  0x5a   :  { %685 = vmatprep.subr.bf16.mxu0 %v2196_v56  ;;  %726 = vmatprep.subr.bf16.mxu1 %v2198_v57 }
  0x5b   :  { %361 = vmatprep.mubr.bf16.mxu0 %v2667_v0  ;;  %434 = vmatprep.mubr.bf16.mxu1 %v2667_v0 }
  0x5d   :  { %686 = vmatpush1.bf16.msra.mxu0 %v2202_v58  ;;  %727 = vmatpush1.bf16.msra.mxu1 %v2204_v59 }
  0x5e   :  { %687 = vmatprep.subr.bf16.mxu0 %v2208_v60  ;;  %728 = vmatprep.subr.bf16.mxu1 %v2210_v61 }
  0x60   :  { %362 = vmatmul.mubr.bf16.gmra.mrb[12].mxu0 %v1820_v62  ;;  %435 = vmatmul.mubr.bf16.gmra.mrb[12].mxu1 %v1820_v62 }
  0x61   :  { %688 = vmatpush1.bf16.msra.mxu0 %v2219_v63  ;;  %729 = vmatpush1.bf16.msra.mxu1 %v2221_v1 }
  0x62   :  { %689 = vmatprep.subr.bf16.mxu0 %v2225_v2  ;;  %730 = vmatprep.subr.bf16.mxu1 %v2227_v3 }
  0x63   :  { %707 = vmatprep.mubr.bf16.mxu0 %v2667_v0  ;;  %748 = vmatprep.mubr.bf16.mxu1 %v2667_v0 }
  0x65   :  { %690 = vmatpush1.bf16.msra.mxu0 %v2231_v4  ;;  %731 = vmatpush1.bf16.msra.mxu1 %v2233_v5 }
  0x66   :  { %792 = vmatprep.subr.bf16.mxu0 %v2125_v33  ;;  %833 = vmatprep.subr.bf16.mxu1 %v2127_v34 }
  0x68   :  { %708 = vmatmul.mubr.bf16.vlgmr.msra.gmra.mrb[16].mxu0 %v509_v6  ;;  %749 = vmatmul.mubr.bf16.vlgmr.msra.gmra.mrb[16].mxu1 %v509_v6 }
  0x69   :  { %793 = vmatpush1.bf16.msra.mxu0 %v2132_v36  ;;  %834 = vmatpush1.bf16.msra.mxu1 %v2134_v37 }
  0x6a   :  { %794 = vmatprep.subr.bf16.mxu0 %v2138_v38  ;;  %835 = vmatprep.subr.bf16.mxu1 %v2140_v39 }
  0x6b   :  { %824 = vmatprep.mubr.bf16.mxu0 %v2667_v0  ;;  %865 = vmatprep.mubr.bf16.mxu1 %v2667_v0 }
  0x6d   :  { %795 = vmatpush1.bf16.msra.mxu0 %v2142_v40  ;;  %836 = vmatpush1.bf16.msra.mxu1 %v2146_v41 }
  0x6e   :  { %796 = vmatprep.subr.bf16.mxu0 %v2150_v42  ;;  %837 = vmatprep.subr.bf16.mxu1 %v2152_v43 }
  0x71   :  { %797 = vmatpush1.bf16.msra.mxu0 %v2159_v45  ;;  %838 = vmatpush1.bf16.msra.mxu1 %v2161_v46 }
  0x72   :  { %798 = vmatprep.subr.bf16.mxu0 %v2165_v47  ;;  %839 = vmatprep.subr.bf16.mxu1 %v2169_v48 }
  0x75   :  { %799 = vmatpush1.bf16.msra.mxu0 %v2171_v49  ;;  %840 = vmatpush1.bf16.msra.mxu1 %v2173_v50 }
  0x76   :  { %800 = vmatprep.subr.bf16.mxu0 %v2177_v51  ;;  %841 = vmatprep.subr.bf16.mxu1 %v2181_v52 }
  0x79   :  { %801 = vmatpush1.bf16.msra.mxu0 %v2190_v54  ;;  %842 = vmatpush1.bf16.msra.mxu1 %v2192_v55 }
  0x7a   :  { %802 = vmatprep.subr.bf16.mxu0 %v2196_v56  ;;  %843 = vmatprep.subr.bf16.mxu1 %v2198_v57 }
  0x7d   :  { %803 = vmatpush1.bf16.msra.mxu0 %v2202_v58  ;;  %844 = vmatpush1.bf16.msra.mxu1 %v2204_v59 }
  0x7e   :  { %804 = vmatprep.subr.bf16.mxu0 %v2208_v60  ;;  %845 = vmatprep.subr.bf16.mxu1 %v2210_v61 }
  0x81   :  { %805 = vmatpush1.bf16.msra.mxu0 %v2219_v63  ;;  %846 = vmatpush1.bf16.msra.mxu1 %v2221_v1 }
  0x82   :  { %806 = vmatprep.subr.bf16.mxu0 %v2225_v2  ;;  %847 = vmatprep.subr.bf16.mxu1 %v2227_v3 }
  0x85   :  { %807 = vmatpush1.bf16.msra.mxu0 %v2231_v4  ;;  %848 = vmatpush1.bf16.msra.mxu1 %v2233_v5 }
  0x86   :  { %910 = vmatprep.subr.bf16.mxu0 %v2125_v33  ;;  %951 = vmatprep.subr.bf16.mxu1 %v2127_v34 }
 0x11b   :  { %v2282_v15 = vpop.f32.mrb[0].mxu0  ;;  %v2284_v16 = vpop.f32.mrb[0].mxu1 }
 0x11c   :  { %v335_v19 = vpop.f32.mrb[1].mxu0  ;;  %v408_v20 = vpop.f32.mrb[1].mxu1 }
 0x11d   :  { %v337_v22 = vpop.f32.mrb[2].mxu0  ;;  %v410_v23 = vpop.f32.mrb[2].mxu1 }
 0x11e   :  { %v2288_v24 = vadd.f32 %v337_v22, %v98_v18  ;;  %v339_v25 = vpop.f32.mrb[3].mxu0  ;;  %v2291_v26 = vadd.f32 %v410_v23, %v2280_v14  ;;  %v412_v27 = vpop.f32.mrb[3].mxu1 }
 0x11f   :  { %v2293_v28 = vadd.f32 %v339_v25, %v102_v21  ;;  %v2296_v29 = vadd.f32 %v412_v27, %v2286_v17 }
 0x123   :  { %v343_v30 = vpop.f32.mrb[4].mxu0  ;;  %v416_v31 = vpop.f32.mrb[4].mxu1 }
 0x124   :  { %v2298_v32 = vadd.f32 %v343_v30, %v98_v18  ;;  %v345_v35 = vpop.f32.mrb[5].mxu0  ;;  %v2301_v44 = vadd.f32 %v416_v31, %v2280_v14  ;;  %v418_v53 = vpop.f32.mrb[5].mxu1 }
 0x125   :  { %v2303_v62 = vadd.f32 %v345_v35, %v102_v21  ;;  %v347_v6 = vpop.f32.mrb[6].mxu0  ;;  %v2306_v7 = vadd.f32 %v418_v53, %v2286_v17  ;;  %v420_v8 = vpop.f32.mrb[6].mxu1 }
 0x126   :  { %v2308_v9 = vadd.f32 %v347_v6, %v98_v18  ;;  %v349_v10 = vpop.f32.mrb[7].mxu0  ;;  %v2311_v11 = vadd.f32 %v420_v8, %v2280_v14  ;;  %v422_v12 = vpop.f32.mrb[7].mxu1 }
 0x127   :  { %2669 = vst [vmem:[#allocation14_spill] sm:$0xff] %v2306_v7  ;;  %v2313_v13 = vadd.f32 %v349_v10, %v102_v21  ;;  %v2316_v22 = vadd.f32 %v422_v12, %v2286_v17 }
 0x128   :  { %2670 = vst [vmem:[#allocation15_spill] sm:$0xff] %v2308_v9  ;;  %2671 = vst [vmem:[#allocation16_spill] sm:$0xff] %v2311_v11 }
 0x129   :  { %2672 = vst [vmem:[#allocation17_spill] sm:$0xff] %v2313_v13  ;;  %2673 = vst [vmem:[#allocation18_spill] sm:$0xff] %v2316_v22 }
 0x12b   :  { %v353_v23 = vpop.f32.mrb[8].mxu0  ;;  %v426_v25 = vpop.f32.mrb[8].mxu1 }
 0x12c   :  { %v2318_v27 = vadd.f32 %v353_v23, %v98_v18  ;;  %v355_v30 = vpop.f32.mrb[9].mxu0  ;;  %v2321_v31 = vadd.f32 %v426_v25, %v2280_v14  ;;  %v428_v35 = vpop.f32.mrb[9].mxu1 }
 0x12d   :  { %v2323_v53 = vadd.f32 %v355_v30, %v102_v21  ;;  %v357_v6 = vpop.f32.mrb[10].mxu0  ;;  %v2326_v8 = vadd.f32 %v428_v35, %v2286_v17  ;;  %v430_v10 = vpop.f32.mrb[10].mxu1 }
 0x12e   :  { %2674 = vst [vmem:[#allocation19_spill] sm:$0xff] %v2318_v27  ;;  %2675 = vst [vmem:[#allocation20_spill] sm:$0xff] %v2321_v31  ;;  %v2328_v0 = vadd.f32 %v357_v6, %v98_v18  ;;  %v359_v12 = vpop.f32.mrb[11].mxu0  ;;  %v2331_v22 = vadd.f32 %v430_v10, %v2280_v14  ;;  %v432_v23 = vpop.f32.mrb[11].mxu1 }
 0x12f   :  { %2676 = vst [vmem:[#allocation21_spill] sm:$0xff] %v2323_v53  ;;  %2677 = vst [vmem:[#allocation22_spill] sm:$0xff] %v2326_v8  ;;  %v2333_v27 = vadd.f32 %v359_v12, %v102_v21  ;;  %v2336_v25 = vadd.f32 %v432_v23, %v2286_v17 }
 0x130   :  { %2678 = vst [vmem:[#allocation23_spill] sm:$0xff] %v2328_v0  ;;  %2679 = vst [vmem:[#allocation24_spill] sm:$0xff] %v2331_v22 }
 0x131   :  { %2680 = vst [vmem:[#allocation25_spill] sm:$0xff] %v2333_v27  ;;  %2681 = vst [vmem:[#allocation26_spill] sm:$0xff] %v2336_v25 }
 0x133   :  { %v363_v31 = vpop.f32.mrb[12].mxu0  ;;  %v436_v30 = vpop.f32.mrb[12].mxu1 }
 0x134   :  { %v2338_v53 = vadd.f32 %v363_v31, %v98_v18  ;;  %v365_v13 = vpop.f32.mrb[13].mxu0  ;;  %v2341_v35 = vadd.f32 %v436_v30, %v2280_v14  ;;  %v438_v6 = vpop.f32.mrb[13].mxu1 }
 0x135   :  { %v2343_v0 = vadd.f32 %v365_v13, %v102_v21  ;;  %v367_v8 = vpop.f32.mrb[14].mxu0  ;;  %v2346_v10 = vadd.f32 %v438_v6, %v2286_v17  ;;  %v440_v12 = vpop.f32.mrb[14].mxu1  ;;  %v334_v13 = vadd.f32 %v2282_v15, %v98_v18  ;;  %v336_v6 = vadd.f32 %v335_v19, %v102_v21 }
 0x136   :  { %2682 = vst [vmem:[#allocation27_spill] sm:$0xff] %v2338_v53  ;;  %2683 = vst [vmem:[#allocation28_spill] sm:$0xff] %v2341_v35  ;;  %v2348_v27 = vadd.f32 %v367_v8, %v98_v18  ;;  %v369_v23 = vpop.f32.mrb[15].mxu0  ;;  %v2351_v25 = vadd.f32 %v440_v12, %v2280_v14  ;;  %v442_v31 = vpop.f32.mrb[15].mxu1 }
 0x137   :  { %2684 = vst [vmem:[#allocation29_spill] sm:$0xff] %v2343_v0  ;;  %2685 = vst [vmem:[#allocation30_spill] sm:$0xff] %v2346_v10  ;;  %v2353_v53 = vadd.f32 %v369_v23, %v102_v21  ;;  %v2356_v30 = vadd.f32 %v442_v31, %v2286_v17  ;;  %v407_v0 = vadd.f32 %v2284_v16, %v2280_v14 }
 0x138   :  { %2686 = vst [vmem:[#allocation31_spill] sm:$0xff] %v2348_v27  ;;  %2687 = vst [vmem:[#allocation32_spill] sm:$0xff] %v2351_v25  ;;  %v409_v10 = vadd.f32 %v408_v20, %v2286_v17 }
 0x139   :  { %2688 = vst [vmem:[#allocation33_spill] sm:$0xff] %v2353_v53  ;;  %2689 = vst [vmem:[#allocation34_spill] sm:$0xff] %v2356_v30 }
 0x13b   :  { %v709_v8 = vpop.f32.mrb[16].mxu0  ;;  %v750_v27 = vpop.f32.mrb[16].mxu1 }
 0x13c   :  { %v757_v35 = vadd.f32 %v709_v8, %v334_v13  ;;  %v759_v22 = vadd.f32 %v750_v27, %v407_v0  ;;  %v711_v12 = vpop.f32.mrb[17].mxu0  ;;  %v752_v25 = vpop.f32.mrb[17].mxu1 }
 0x13d   :  { %v758_v11 = vadd.f32 %v711_v12, %v336_v6  ;;  %v760_v23 = vadd.f32 %v752_v25, %v409_v10  ;;  %v713_v53 = vpop.f32.mrb[18].mxu0  ;;  %v754_v9 = vpop.f32.mrb[18].mxu1 }
 0x13e   :  { %v1702_v31 = vmul.f32 -1.442695, %v759_v22  ;;  %v714_v30 = vpop.f32.mrb[19].mxu0  ;;  %v755_v7 = vpop.f32.mrb[19].mxu1 }
 0x13f   :  { %v1701_v15 = vmul.f32 -1.442695, %v758_v11  ;;  %v1703_v14 = vmul.f32 -1.442695, %v760_v23 }
 0x140   :  { %1833 = vpow2.f32 %v1702_v31 }
 0x141   :  { %1835 = vpow2.f32 %v1701_v15 }
 0x142   :  { %1837 = vpow2.f32 %v1703_v14 }
 0x143   :  { %1839 = vtanh.f32 %v757_v35  ;;  %v2690_v35 = vmov 0  }
 0x14a   :  { %v1834_v16 = vpop.eup %1833 }
 0x14b   :  { %v1836_v18 = vpop.eup %1835  ;;  %v772_v17 = vadd.f32 1.0, %v1834_v16 }
 0x14c   :  { %v771_v19 = vadd.f32 1.0, %v1836_v18  ;;  %v1838_v0 = vpop.eup %1837 }
 0x14d   :  { %v1840_v20 = vpop.eup %1839  ;;  %v773_v27 = vadd.f32 1.0, %v1838_v0 }
 0x14e   :  { %1841 = vrcp.f32 %v771_v19 }
 0x14f   :  { %1843 = vrcp.f32 %v772_v17 }
 0x150   :  { %1845 = vrcp.f32 %v773_v27 }
 0x158   :  { %v1842_v21 = vpop.eup %1841 }
 0x159   :  { %v780_v9 = vmul.f32 %v1842_v21, %v1840_v20  ;;  %v1844_v22 = vpop.eup %1843 }
 0x15a   :  { %v1846_v7 = vpop.eup %1845 }
 0x15b   :  { %v2362_v53 = vadd.f32 %v1844_v22, %v780_v9 }
 0x15d   :  { %1847 = vtanh.f32 %v2362_v53 }
 0x167   :  { %v1848_v11 = vpop.eup %1847 }
 0x168   :  { %v784_v25 = vmul.f32 %v1848_v11, %v1846_v7 }
 0x16a   :  { %785 = vst [vmem:[#allocation10] sm:$0xff] %v784_v25  ;;  %v786_v10 = vpack.c.bf16 %v784_v25, %v784_v25 }
 0x16c   :  { %825 = vmatmul.mubr.bf16.vlgmr.msra.gmra.mrb[20].mxu0 %v786_v10  ;;  %866 = vmatmul.mubr.bf16.vlgmr.msra.gmra.mrb[20].mxu1 %v786_v10 }
 0x16d   :  { %911 = vmatpush1.bf16.msra.mxu0 %v2132_v36  ;;  %952 = vmatpush1.bf16.msra.mxu1 %v2134_v37 }
 0x16e   :  { %912 = vmatprep.subr.bf16.mxu0 %v2138_v38  ;;  %953 = vmatprep.subr.bf16.mxu1 %v2140_v39 }
 0x16f   :  { %942 = vmatprep.mubr.bf16.mxu0 %v2690_v35  ;;  %983 = vmatprep.mubr.bf16.mxu1 %v2690_v35 }
 0x171   :  { %913 = vmatpush1.bf16.msra.mxu0 %v2142_v40  ;;  %954 = vmatpush1.bf16.msra.mxu1 %v2146_v41 }
 0x172   :  { %914 = vmatprep.subr.bf16.mxu0 %v2150_v42  ;;  %955 = vmatprep.subr.bf16.mxu1 %v2152_v43 }
 0x175   :  { %915 = vmatpush1.bf16.msra.mxu0 %v2159_v45  ;;  %956 = vmatpush1.bf16.msra.mxu1 %v2161_v46 }
 0x176   :  { %916 = vmatprep.subr.bf16.mxu0 %v2165_v47  ;;  %957 = vmatprep.subr.bf16.mxu1 %v2169_v48 }
 0x179   :  { %917 = vmatpush1.bf16.msra.mxu0 %v2171_v49  ;;  %958 = vmatpush1.bf16.msra.mxu1 %v2173_v50 }
 0x17a   :  { %918 = vmatprep.subr.bf16.mxu0 %v2177_v51  ;;  %959 = vmatprep.subr.bf16.mxu1 %v2181_v52 }
 0x17d   :  { %919 = vmatpush1.bf16.msra.mxu0 %v2190_v54  ;;  %960 = vmatpush1.bf16.msra.mxu1 %v2192_v55 }
 0x17e   :  { %920 = vmatprep.subr.bf16.mxu0 %v2196_v56  ;;  %961 = vmatprep.subr.bf16.mxu1 %v2198_v57 }
 0x181   :  { %921 = vmatpush1.bf16.msra.mxu0 %v2202_v58  ;;  %962 = vmatpush1.bf16.msra.mxu1 %v2204_v59 }
 0x182   :  { %922 = vmatprep.subr.bf16.mxu0 %v2208_v60  ;;  %963 = vmatprep.subr.bf16.mxu1 %v2210_v61 }
 0x185   :  { %923 = vmatpush1.bf16.msra.mxu0 %v2219_v63  ;;  %964 = vmatpush1.bf16.msra.mxu1 %v2221_v1 }
 0x186   :  { %924 = vmatprep.subr.bf16.mxu0 %v2225_v2  ;;  %965 = vmatprep.subr.bf16.mxu1 %v2227_v3 }
 0x189   :  { %925 = vmatpush1.bf16.msra.mxu0 %v2231_v4  ;;  %966 = vmatpush1.bf16.msra.mxu1 %v2233_v5 }
 0x18a   :  { %1028 = vmatprep.subr.bf16.mxu0 %v2125_v33  ;;  %1069 = vmatprep.subr.bf16.mxu1 %v2127_v34 }
 0x23f   :  { %v826_v30 = vpop.f32.mrb[20].mxu0  ;;  %v867_v13 = vpop.f32.mrb[20].mxu1 }
 0x240   :  { %v874_v6 = vadd.f32 %v826_v30, %v2288_v24  ;;  %v876_v8 = vadd.f32 %v867_v13, %v2291_v26  ;;  %v828_v12 = vpop.f32.mrb[21].mxu0  ;;  %v869_v23 = vpop.f32.mrb[21].mxu1 }
 0x241   :  { %v875_v31 = vadd.f32 %v828_v12, %v2293_v28  ;;  %v877_v15 = vadd.f32 %v869_v23, %v2296_v29  ;;  %v830_v14 = vpop.f32.mrb[22].mxu0  ;;  %v871_v16 = vpop.f32.mrb[22].mxu1 }
 0x242   :  { %v1705_v18 = vmul.f32 -1.442695, %v876_v8  ;;  %v831_v17 = vpop.f32.mrb[23].mxu0  ;;  %v872_v19 = vpop.f32.mrb[23].mxu1 }
 0x243   :  { %v1704_v0 = vmul.f32 -1.442695, %v875_v31  ;;  %v1706_v20 = vmul.f32 -1.442695, %v877_v15 }
 0x244   :  { %1849 = vpow2.f32 %v1705_v18  ;;  %v2691_v18 = vld [vmem:[#allocation14_spill] sm:$0xff] }
 0x245   :  { %1851 = vpow2.f32 %v1704_v0 }
 0x246   :  { %1853 = vpow2.f32 %v1706_v20 }
 0x247   :  { %1855 = vtanh.f32 %v874_v6 }
 0x24e   :  { %v1850_v21 = vpop.eup %1849 }
 0x24f   :  { %v1852_v27 = vpop.eup %1851  ;;  %v889_v24 = vadd.f32 1.0, %v1850_v21 }
 0x250   :  { %v888_v26 = vadd.f32 1.0, %v1852_v27  ;;  %v1854_v28 = vpop.eup %1853 }
 0x251   :  { %1857 = vrcp.f32 %v889_v24  ;;  %v1856_v9 = vpop.eup %1855  ;;  %v890_v11 = vadd.f32 1.0, %v1854_v28 }
 0x252   :  { %1859 = vrcp.f32 %v888_v26 }
 0x253   :  { %1861 = vrcp.f32 %v890_v11 }
 0x25b   :  { %v1858_v29 = vpop.eup %1857 }
 0x25c   :  { %v1860_v22 = vpop.eup %1859  ;;  %v898_v7 = vmul.f32 %v1858_v29, %v2362_v53 }
 0x25d   :  { %v897_v25 = vmul.f32 %v1860_v22, %v1856_v9  ;;  %v1862_v30 = vpop.eup %1861 }
 0x25f   :  { %v2404_v10 = vadd.f32 %v898_v7, %v897_v25 }
 0x261   :  { %1863 = vtanh.f32 %v2404_v10 }
 0x26b   :  { %v1864_v13 = vpop.eup %1863 }
 0x26c   :  { %v901_v8 = vmul.f32 %v1864_v13, %v1862_v30 }
 0x26e   :  { %903 = vst [vmem:[#allocation10 + $0x8] sm:$0xff] %v901_v8  ;;  %v904_v6 = vpack.c.bf16 %v901_v8, %v901_v8 }
 0x270   :  { %943 = vmatmul.mubr.bf16.vlgmr.msra.gmra.mrb[24].mxu0 %v904_v6  ;;  %984 = vmatmul.mubr.bf16.vlgmr.msra.gmra.mrb[24].mxu1 %v904_v6 }
 0x271   :  { %1029 = vmatpush1.bf16.msra.mxu0 %v2132_v36  ;;  %1070 = vmatpush1.bf16.msra.mxu1 %v2134_v37 }
 0x272   :  { %1030 = vmatprep.subr.bf16.mxu0 %v2138_v38  ;;  %1071 = vmatprep.subr.bf16.mxu1 %v2140_v39 }
 0x273   :  { %1060 = vmatprep.mubr.bf16.mxu0 %v2690_v35  ;;  %1101 = vmatprep.mubr.bf16.mxu1 %v2690_v35 }
 0x275   :  { %1031 = vmatpush1.bf16.msra.mxu0 %v2142_v40  ;;  %1072 = vmatpush1.bf16.msra.mxu1 %v2146_v41 }
 0x276   :  { %1032 = vmatprep.subr.bf16.mxu0 %v2150_v42  ;;  %1073 = vmatprep.subr.bf16.mxu1 %v2152_v43 }
 0x279   :  { %1033 = vmatpush1.bf16.msra.mxu0 %v2159_v45  ;;  %1074 = vmatpush1.bf16.msra.mxu1 %v2161_v46 }
 0x27a   :  { %1034 = vmatprep.subr.bf16.mxu0 %v2165_v47  ;;  %1075 = vmatprep.subr.bf16.mxu1 %v2169_v48 }
 0x27d   :  { %1035 = vmatpush1.bf16.msra.mxu0 %v2171_v49  ;;  %1076 = vmatpush1.bf16.msra.mxu1 %v2173_v50 }
 0x27e   :  { %1036 = vmatprep.subr.bf16.mxu0 %v2177_v51  ;;  %1077 = vmatprep.subr.bf16.mxu1 %v2181_v52 }
 0x281   :  { %1037 = vmatpush1.bf16.msra.mxu0 %v2190_v54  ;;  %1078 = vmatpush1.bf16.msra.mxu1 %v2192_v55 }
 0x282   :  { %1038 = vmatprep.subr.bf16.mxu0 %v2196_v56  ;;  %1079 = vmatprep.subr.bf16.mxu1 %v2198_v57 }
 0x285   :  { %1039 = vmatpush1.bf16.msra.mxu0 %v2202_v58  ;;  %1080 = vmatpush1.bf16.msra.mxu1 %v2204_v59 }
 0x286   :  { %1040 = vmatprep.subr.bf16.mxu0 %v2208_v60  ;;  %1081 = vmatprep.subr.bf16.mxu1 %v2210_v61 }
 0x289   :  { %1041 = vmatpush1.bf16.msra.mxu0 %v2219_v63  ;;  %1082 = vmatpush1.bf16.msra.mxu1 %v2221_v1 }
 0x28a   :  { %1042 = vmatprep.subr.bf16.mxu0 %v2225_v2  ;;  %1083 = vmatprep.subr.bf16.mxu1 %v2227_v3 }
 0x28d   :  { %1043 = vmatpush1.bf16.msra.mxu0 %v2231_v4  ;;  %1084 = vmatpush1.bf16.msra.mxu1 %v2233_v5 }
 0x28e   :  { %1146 = vmatprep.subr.bf16.mxu0 %v2125_v33  ;;  %1187 = vmatprep.subr.bf16.mxu1 %v2127_v34 }
 0x343   :  { %v944_v53 = vpop.f32.mrb[24].mxu0  ;;  %v985_v12 = vpop.f32.mrb[24].mxu1 }
 0x344   :  { %v992_v23 = vadd.f32 %v944_v53, %v2298_v32  ;;  %v994_v31 = vadd.f32 %v985_v12, %v2301_v44  ;;  %v946_v15 = vpop.f32.mrb[25].mxu0  ;;  %v987_v14 = vpop.f32.mrb[25].mxu1 }
 0x345   :  { %v993_v16 = vadd.f32 %v946_v15, %v2303_v62  ;;  %v995_v17 = vadd.f32 %v987_v14, %v2691_v18  ;;  %v948_v19 = vpop.f32.mrb[26].mxu0  ;;  %v989_v0 = vpop.f32.mrb[26].mxu1  ;;  %v2693_v14 = vld [vmem:[#allocation16_spill] sm:$0xff] }
 0x346   :  { %v1708_v20 = vmul.f32 -1.442695, %v994_v31  ;;  %v949_v21 = vpop.f32.mrb[27].mxu0  ;;  %v990_v27 = vpop.f32.mrb[27].mxu1  ;;  %v2692_v31 = vld [vmem:[#allocation15_spill] sm:$0xff]  ;;  %v2694_v19 = vld [vmem:[#allocation17_spill] sm:$0xff] }
 0x347   :  { %v1707_v24 = vmul.f32 -1.442695, %v993_v16  ;;  %v1709_v26 = vmul.f32 -1.442695, %v995_v17 }
 0x348   :  { %1865 = vpow2.f32 %v1708_v20  ;;  %v2695_v20 = vld [vmem:[#allocation18_spill] sm:$0xff] }
 0x349   :  { %1867 = vpow2.f32 %v1707_v24 }
 0x34a   :  { %1869 = vpow2.f32 %v1709_v26 }
 0x34b   :  { %1871 = vtanh.f32 %v992_v23 }
 0x352   :  { %v1866_v28 = vpop.eup %1865 }
 0x353   :  { %v1868_v9 = vpop.eup %1867  ;;  %v1007_v32 = vadd.f32 1.0, %v1866_v28 }
 0x354   :  { %v1006_v44 = vadd.f32 1.0, %v1868_v9  ;;  %v1870_v62 = vpop.eup %1869 }
 0x355   :  { %1873 = vrcp.f32 %v1007_v32  ;;  %v1872_v29 = vpop.eup %1871  ;;  %v1008_v25 = vadd.f32 1.0, %v1870_v62 }
 0x356   :  { %1875 = vrcp.f32 %v1006_v44 }
 0x357   :  { %1877 = vrcp.f32 %v1008_v25 }
 0x35f   :  { %v1874_v22 = vpop.eup %1873 }
 0x360   :  { %v1876_v7 = vpop.eup %1875  ;;  %v1016_v11 = vmul.f32 %v1874_v22, %v2404_v10 }
 0x361   :  { %v1015_v30 = vmul.f32 %v1876_v7, %v1872_v29  ;;  %v1878_v8 = vpop.eup %1877 }
 0x363   :  { %v2446_v13 = vadd.f32 %v1016_v11, %v1015_v30 }
 0x365   :  { %1879 = vtanh.f32 %v2446_v13 }
 0x36f   :  { %v1880_v6 = vpop.eup %1879 }
 0x370   :  { %v1019_v53 = vmul.f32 %v1880_v6, %v1878_v8 }
 0x372   :  { %1021 = vst [vmem:[#allocation10 + $0x10] sm:$0xff] %v1019_v53  ;;  %v1022_v12 = vpack.c.bf16 %v1019_v53, %v1019_v53 }
 0x374   :  { %1061 = vmatmul.mubr.bf16.vlgmr.msra.gmra.mrb[28].mxu0 %v1022_v12  ;;  %1102 = vmatmul.mubr.bf16.vlgmr.msra.gmra.mrb[28].mxu1 %v1022_v12 }
 0x375   :  { %1147 = vmatpush1.bf16.msra.mxu0 %v2132_v36  ;;  %1188 = vmatpush1.bf16.msra.mxu1 %v2134_v37 }
 0x376   :  { %1148 = vmatprep.subr.bf16.mxu0 %v2138_v38  ;;  %1189 = vmatprep.subr.bf16.mxu1 %v2140_v39 }
 0x377   :  { %1178 = vmatprep.mubr.bf16.mxu0 %v2690_v35  ;;  %1219 = vmatprep.mubr.bf16.mxu1 %v2690_v35 }
 0x379   :  { %1149 = vmatpush1.bf16.msra.mxu0 %v2142_v40  ;;  %1190 = vmatpush1.bf16.msra.mxu1 %v2146_v41 }
 0x37a   :  { %1150 = vmatprep.subr.bf16.mxu0 %v2150_v42  ;;  %1191 = vmatprep.subr.bf16.mxu1 %v2152_v43 }
 0x37d   :  { %1151 = vmatpush1.bf16.msra.mxu0 %v2159_v45  ;;  %1192 = vmatpush1.bf16.msra.mxu1 %v2161_v46 }
 0x37e   :  { %1152 = vmatprep.subr.bf16.mxu0 %v2165_v47  ;;  %1193 = vmatprep.subr.bf16.mxu1 %v2169_v48 }
 0x381   :  { %1153 = vmatpush1.bf16.msra.mxu0 %v2171_v49  ;;  %1194 = vmatpush1.bf16.msra.mxu1 %v2173_v50 }
 0x382   :  { %1154 = vmatprep.subr.bf16.mxu0 %v2177_v51  ;;  %1195 = vmatprep.subr.bf16.mxu1 %v2181_v52 }
 0x385   :  { %1155 = vmatpush1.bf16.msra.mxu0 %v2190_v54  ;;  %1196 = vmatpush1.bf16.msra.mxu1 %v2192_v55 }
 0x386   :  { %1156 = vmatprep.subr.bf16.mxu0 %v2196_v56  ;;  %1197 = vmatprep.subr.bf16.mxu1 %v2198_v57 }
 0x389   :  { %1157 = vmatpush1.bf16.msra.mxu0 %v2202_v58  ;;  %1198 = vmatpush1.bf16.msra.mxu1 %v2204_v59 }
 0x38a   :  { %1158 = vmatprep.subr.bf16.mxu0 %v2208_v60  ;;  %1199 = vmatprep.subr.bf16.mxu1 %v2210_v61 }
 0x38d   :  { %1159 = vmatpush1.bf16.msra.mxu0 %v2219_v63  ;;  %1200 = vmatpush1.bf16.msra.mxu1 %v2221_v1 }
 0x38e   :  { %1160 = vmatprep.subr.bf16.mxu0 %v2225_v2  ;;  %1201 = vmatprep.subr.bf16.mxu1 %v2227_v3 }
 0x391   :  { %1161 = vmatpush1.bf16.msra.mxu0 %v2231_v4  ;;  %1202 = vmatpush1.bf16.msra.mxu1 %v2233_v5 }
 0x392   :  { %1264 = vmatprep.subr.bf16.mxu0 %v2125_v33  ;;  %1305 = vmatprep.subr.bf16.mxu1 %v2127_v34 }
 0x447   :  { %v1062_v10 = vpop.f32.mrb[28].mxu0  ;;  %v1103_v23 = vpop.f32.mrb[28].mxu1 }
 0x448   :  { %v1110_v15 = vadd.f32 %v1062_v10, %v2692_v31  ;;  %v1112_v16 = vadd.f32 %v1103_v23, %v2693_v14  ;;  %v1064_v18 = vpop.f32.mrb[29].mxu0  ;;  %v1105_v17 = vpop.f32.mrb[29].mxu1 }
 0x449   :  { %v1111_v0 = vadd.f32 %v1064_v18, %v2694_v19  ;;  %v1113_v21 = vadd.f32 %v1105_v17, %v2695_v20  ;;  %v1066_v27 = vpop.f32.mrb[30].mxu0  ;;  %v1107_v24 = vpop.f32.mrb[30].mxu1 }
 0x44a   :  { %v1711_v26 = vmul.f32 -1.442695, %v1112_v16  ;;  %v1067_v28 = vpop.f32.mrb[31].mxu0  ;;  %v1108_v9 = vpop.f32.mrb[31].mxu1 }
 0x44b   :  { %v1710_v33 = vmul.f32 -1.442695, %v1111_v0  ;;  %v1712_v34 = vmul.f32 -1.442695, %v1113_v21 }
 0x44c   :  { %1881 = vpow2.f32 %v1711_v26 }
 0x44d   :  { %1883 = vpow2.f32 %v1710_v33 }
 0x44e   :  { %1885 = vpow2.f32 %v1712_v34 }
 0x44f   :  { %1887 = vtanh.f32 %v1110_v15 }
 0x456   :  { %v1882_v32 = vpop.eup %1881 }
 0x457   :  { %v1884_v44 = vpop.eup %1883  ;;  %v1125_v62 = vadd.f32 1.0, %v1882_v32  ;;  %v2537_v32 = vld [vmem:[#allocation8] ss:$16 sps:$4 sm:$0xff]  }
 0x458   :  { %v1124_v29 = vadd.f32 1.0, %v1884_v44  ;;  %v1886_v22 = vpop.eup %1885  ;;  %v2540_v44 = vld [vmem:[#allocation8 + $0x8] ss:$16 sps:$4 sm:$0xff]  }
 0x459   :  { %1889 = vrcp.f32 %v1125_v62  ;;  %v1888_v7 = vpop.eup %1887  ;;  %v1126_v8 = vadd.f32 1.0, %v1886_v22  ;;  %v2543_v62 = vld [vmem:[#allocation8 + $0x24] ss:$16 sps:$4 sm:$0xff]   ;;  %v2551_v22 = vld [vmem:[#allocation8 + $0x20] ss:$16 sps:$4 sm:$0xff]  }
 0x45a   :  { %1891 = vrcp.f32 %v1124_v29  ;;  %v2546_v29 = vld [vmem:[#allocation8 + $0x2c] ss:$16 sps:$4 sm:$0xff]  }
 0x45b   :  { %1893 = vrcp.f32 %v1126_v8  ;;  %v2566_v8 = vld [vmem:[#allocation8 + $0x48] ss:$16 sps:$4 sm:$0xff]  }
 0x463   :  { %v1890_v11 = vpop.eup %1889 }
 0x464   :  { %v1892_v25 = vpop.eup %1891  ;;  %v1134_v30 = vmul.f32 %v1890_v11, %v2446_v13  ;;  %v2557_v11 = vld [vmem:[#allocation8 + $0x44] ss:$16 sps:$4 sm:$0xff]  }
 0x465   :  { %v1133_v6 = vmul.f32 %v1892_v25, %v1888_v7  ;;  %v1894_v12 = vpop.eup %1893  ;;  %v2554_v7 = vld [vmem:[#allocation8 + $0x28] ss:$16 sps:$4 sm:$0xff]   ;;  %v2560_v25 = vld [vmem:[#allocation8 + $0x4c] ss:$16 sps:$4 sm:$0xff]  }
 0x467   :  { %v2488_v53 = vadd.f32 %v1134_v30, %v1133_v6  ;;  %v2563_v30 = vld [vmem:[#allocation8 + $0x40] ss:$16 sps:$4 sm:$0xff]   ;;  %v2569_v6 = vld [vmem:[#allocation8 + $0x64] ss:$16 sps:$4 sm:$0xff]  }
 0x469   :  { %1895 = vtanh.f32 %v2488_v53 }
 0x473   :  { %v1896_v10 = vpop.eup %1895 }
 0x474   :  { %v1137_v23 = vmul.f32 %v1896_v10, %v1894_v12  ;;  %v2575_v12 = vld [vmem:[#allocation8 + $0x60] ss:$16 sps:$4 sm:$0xff]   ;;  %v2578_v10 = vld [vmem:[#allocation8 + $0x68] ss:$16 sps:$4 sm:$0xff]  }
 0x476   :  { %1139 = vst [vmem:[#allocation10 + $0x18] sm:$0xff] %v1137_v23  ;;  %v1140_v31 = vpack.c.bf16 %v1137_v23, %v1137_v23  ;;  %v2581_v23 = vld [vmem:[#allocation8 + $0x84] ss:$16 sps:$4 sm:$0xff]  }
 0x478   :  { %1179 = vmatmul.mubr.bf16.vlgmr.msra.gmra.mrb[32].mxu0 %v1140_v31  ;;  %1220 = vmatmul.mubr.bf16.vlgmr.msra.gmra.mrb[32].mxu1 %v1140_v31  ;;  %v2584_v31 = vld [vmem:[#allocation8 + $0x8c] ss:$16 sps:$4 sm:$0xff]  }
 0x479   :  { %1265 = vmatpush1.bf16.msra.mxu0 %v2132_v36  ;;  %1306 = vmatpush1.bf16.msra.mxu1 %v2134_v37  ;;  %v2523_v36 = vld [vmem:[#allocation8 + $0x4] ss:$16 sps:$4 sm:$0xff]   ;;  %v2526_v37 = vld [vmem:[#allocation8 + $0xc] ss:$16 sps:$4 sm:$0xff]  }
 0x47a   :  { %1266 = vmatprep.subr.bf16.mxu0 %v2138_v38  ;;  %1307 = vmatprep.subr.bf16.mxu1 %v2140_v39 }
 0x47b   :  { %1296 = vmatprep.mubr.bf16.mxu0 %v2690_v35  ;;  %1337 = vmatprep.mubr.bf16.mxu1 %v2690_v35 }
 0x47d   :  { %1267 = vmatpush1.bf16.msra.mxu0 %v2142_v40  ;;  %1308 = vmatpush1.bf16.msra.mxu1 %v2146_v41  ;;  %v2696_v40 = vld [vmem:[#allocation19_spill] sm:$0xff] }
 0x47e   :  { %1268 = vmatprep.subr.bf16.mxu0 %v2150_v42  ;;  %1309 = vmatprep.subr.bf16.mxu1 %v2152_v43  ;;  %v2697_v42 = vld [vmem:[#allocation20_spill] sm:$0xff] }
 0x481   :  { %1269 = vmatpush1.bf16.msra.mxu0 %v2159_v45  ;;  %1310 = vmatpush1.bf16.msra.mxu1 %v2161_v46 }
 0x482   :  { %1270 = vmatprep.subr.bf16.mxu0 %v2165_v47  ;;  %1311 = vmatprep.subr.bf16.mxu1 %v2169_v48  ;;  %v2698_v47 = vld [vmem:[#allocation21_spill] sm:$0xff] }
 0x485   :  { %1271 = vmatpush1.bf16.msra.mxu0 %v2171_v49  ;;  %1312 = vmatpush1.bf16.msra.mxu1 %v2173_v50  ;;  %v2699_v49 = vld [vmem:[#allocation22_spill] sm:$0xff] }
 0x486   :  { %1272 = vmatprep.subr.bf16.mxu0 %v2177_v51  ;;  %1313 = vmatprep.subr.bf16.mxu1 %v2181_v52 }
 0x489   :  { %1273 = vmatpush1.bf16.msra.mxu0 %v2190_v54  ;;  %1314 = vmatpush1.bf16.msra.mxu1 %v2192_v55 }
 0x48a   :  { %1274 = vmatprep.subr.bf16.mxu0 %v2196_v56  ;;  %1315 = vmatprep.subr.bf16.mxu1 %v2198_v57 }
 0x48d   :  { %1275 = vmatpush1.bf16.msra.mxu0 %v2202_v58  ;;  %1316 = vmatpush1.bf16.msra.mxu1 %v2204_v59 }
 0x48e   :  { %1276 = vmatprep.subr.bf16.mxu0 %v2208_v60  ;;  %1317 = vmatprep.subr.bf16.mxu1 %v2210_v61 }
 0x491   :  { %1277 = vmatpush1.bf16.msra.mxu0 %v2219_v63  ;;  %1318 = vmatpush1.bf16.msra.mxu1 %v2221_v1 }
 0x492   :  { %1278 = vmatprep.subr.bf16.mxu0 %v2225_v2  ;;  %1319 = vmatprep.subr.bf16.mxu1 %v2227_v3 }
 0x495   :  { %1279 = vmatpush1.bf16.msra.mxu0 %v2231_v4  ;;  %1320 = vmatpush1.bf16.msra.mxu1 %v2233_v5 }
 0x496   :  { %1382 = vmatprep.subr.bf16.mxu0 %v2523_v36  ;;  %1423 = vmatprep.subr.bf16.mxu1 %v2526_v37 }
 0x54b   :  { %v1180_v38 = vpop.f32.mrb[32].mxu0  ;;  %v1221_v39 = vpop.f32.mrb[32].mxu1 }
 0x54c   :  { %v1228_v41 = vadd.f32 %v1180_v38, %v2696_v40  ;;  %v1230_v43 = vadd.f32 %v1221_v39, %v2697_v42  ;;  %v1182_v45 = vpop.f32.mrb[33].mxu0  ;;  %v1223_v46 = vpop.f32.mrb[33].mxu1  ;;  %v2587_v38 = vld [vmem:[#allocation8 + $0x80] ss:$16 sps:$4 sm:$0xff]   ;;  %v2590_v39 = vld [vmem:[#allocation8 + $0x88] ss:$16 sps:$4 sm:$0xff]  }
 0x54d   :  { %v1229_v48 = vadd.f32 %v1182_v45, %v2698_v47  ;;  %v1231_v50 = vadd.f32 %v1223_v46, %v2699_v49  ;;  %v1184_v51 = vpop.f32.mrb[34].mxu0  ;;  %v1225_v52 = vpop.f32.mrb[34].mxu1  ;;  %v2593_v40 = vld [vmem:[#allocation8 + $0xa4] ss:$16 sps:$4 sm:$0xff]   ;;  %v2702_v45 = vld [vmem:[#allocation25_spill] sm:$0xff] }
 0x54e   :  { %v1714_v54 = vmul.f32 -1.442695, %v1230_v43  ;;  %v1185_v55 = vpop.f32.mrb[35].mxu0  ;;  %v1226_v56 = vpop.f32.mrb[35].mxu1  ;;  %v2701_v42 = vld [vmem:[#allocation24_spill] sm:$0xff]  ;;  %v2703_v46 = vld [vmem:[#allocation26_spill] sm:$0xff] }
 0x54f   :  { %v1713_v57 = vmul.f32 -1.442695, %v1229_v48  ;;  %v1715_v13 = vmul.f32 -1.442695, %v1231_v50 }
 0x550   :  { %1897 = vpow2.f32 %v1714_v54 }
 0x551   :  { %1899 = vpow2.f32 %v1713_v57 }
 0x552   :  { %1901 = vpow2.f32 %v1715_v13 }
 0x553   :  { %1903 = vtanh.f32 %v1228_v41  ;;  %v2596_v41 = vld [vmem:[#allocation8 + $0xac] ss:$16 sps:$4 sm:$0xff]  }
 0x55a   :  { %v1898_v15 = vpop.eup %1897 }
 0x55b   :  { %v1900_v14 = vpop.eup %1899  ;;  %v1243_v16 = vadd.f32 1.0, %v1898_v15 }
 0x55c   :  { %v1242_v18 = vadd.f32 1.0, %v1900_v14  ;;  %v1902_v17 = vpop.eup %1901 }
 0x55d   :  { %1905 = vrcp.f32 %v1243_v16  ;;  %v1904_v19 = vpop.eup %1903  ;;  %v1244_v27 = vadd.f32 1.0, %v1902_v17 }
 0x55e   :  { %1907 = vrcp.f32 %v1242_v18 }
 0x55f   :  { %1909 = vrcp.f32 %v1244_v27  ;;  %v1985_v27 = vld [vmem:[#allocation8 + $0xc4] ss:$16 sps:$4 sm:$0xff]  }
 0x567   :  { %v1906_v0 = vpop.eup %1905 }
 0x568   :  { %v1908_v20 = vpop.eup %1907  ;;  %v1252_v21 = vmul.f32 %v1906_v0, %v2488_v53  ;;  %v2572_v53 = vld [vmem:[#allocation8 + $0x6c] ss:$16 sps:$4 sm:$0xff]  }
 0x569   :  { %v1251_v24 = vmul.f32 %v1908_v20, %v1904_v19  ;;  %v1910_v28 = vpop.eup %1909 }
 0x56b   :  { %v2534_v26 = vadd.f32 %v1252_v21, %v1251_v24  ;;  %v1984_v21 = vld [vmem:[#allocation8 + $0xa8] ss:$16 sps:$4 sm:$0xff]   ;;  %v1986_v24 = vld [vmem:[#allocation8 + $0xcc] ss:$16 sps:$4 sm:$0xff]  }
 0x56d   :  { %1911 = vtanh.f32 %v2534_v26 }
 0x577   :  { %v1912_v9 = vpop.eup %1911 }
 0x578   :  { %v1255_v33 = vmul.f32 %v1912_v9, %v1910_v28  ;;  %v1988_v28 = vld [vmem:[#allocation8 + $0xc8] ss:$16 sps:$4 sm:$0xff]   ;;  %v1989_v9 = vld [vmem:[#allocation8 + $0xe4] ss:$16 sps:$4 sm:$0xff]  }
 0x57a   :  { %1257 = vst [vmem:[#allocation10 + $0x20] sm:$0xff] %v1255_v33  ;;  %v1258_v34 = vpack.c.bf16 %v1255_v33, %v1255_v33  ;;  %v1990_v33 = vld [vmem:[#allocation8 + $0xec] ss:$16 sps:$4 sm:$0xff]  }
 0x57c   :  { %1297 = vmatmul.mubr.bf16.vlgmr.msra.gmra.mrb[36].mxu0 %v1258_v34  ;;  %1338 = vmatmul.mubr.bf16.vlgmr.msra.gmra.mrb[36].mxu1 %v1258_v34  ;;  %v1991_v34 = vld [vmem:[#allocation8 + $0xe0] ss:$16 sps:$4 sm:$0xff]  }
 0x57d   :  { %1383 = vmatpush1.bf16.msra.mxu0 %v2537_v32  ;;  %1424 = vmatpush1.bf16.msra.mxu1 %v2540_v44 }
 0x57e   :  { %1384 = vmatprep.subr.bf16.mxu0 %v2543_v62  ;;  %1425 = vmatprep.subr.bf16.mxu1 %v2546_v29 }
 0x57f   :  { %1414 = vmatprep.mubr.bf16.mxu0 %v2690_v35  ;;  %1455 = vmatprep.mubr.bf16.mxu1 %v2690_v35 }
 0x581   :  { %1385 = vmatpush1.bf16.msra.mxu0 %v2551_v22  ;;  %1426 = vmatpush1.bf16.msra.mxu1 %v2554_v7 }
 0x582   :  { %1386 = vmatprep.subr.bf16.mxu0 %v2557_v11  ;;  %1427 = vmatprep.subr.bf16.mxu1 %v2560_v25 }
 0x585   :  { %1387 = vmatpush1.bf16.msra.mxu0 %v2563_v30  ;;  %1428 = vmatpush1.bf16.msra.mxu1 %v2566_v8 }
 0x586   :  { %1388 = vmatprep.subr.bf16.mxu0 %v2569_v6  ;;  %1429 = vmatprep.subr.bf16.mxu1 %v2572_v53 }
 0x589   :  { %1389 = vmatpush1.bf16.msra.mxu0 %v2575_v12  ;;  %1430 = vmatpush1.bf16.msra.mxu1 %v2578_v10 }
 0x58a   :  { %1390 = vmatprep.subr.bf16.mxu0 %v2581_v23  ;;  %1431 = vmatprep.subr.bf16.mxu1 %v2584_v31 }
 0x58d   :  { %1391 = vmatpush1.bf16.msra.mxu0 %v2587_v38  ;;  %1432 = vmatpush1.bf16.msra.mxu1 %v2590_v39 }
 0x58e   :  { %1392 = vmatprep.subr.bf16.mxu0 %v2593_v40  ;;  %1433 = vmatprep.subr.bf16.mxu1 %v2596_v41 }
 0x591   :  { %1393 = vmatpush1.bf16.msra.mxu0 %v2202_v58  ;;  %1434 = vmatpush1.bf16.msra.mxu1 %v2204_v59 }
 0x592   :  { %1394 = vmatprep.subr.bf16.mxu0 %v2208_v60  ;;  %1435 = vmatprep.subr.bf16.mxu1 %v2210_v61  ;;  %v2700_v60 = vld [vmem:[#allocation23_spill] sm:$0xff] }
 0x595   :  { %1395 = vmatpush1.bf16.msra.mxu0 %v2219_v63  ;;  %1436 = vmatpush1.bf16.msra.mxu1 %v2221_v1 }
 0x596   :  { %1396 = vmatprep.subr.bf16.mxu0 %v2225_v2  ;;  %1437 = vmatprep.subr.bf16.mxu1 %v2227_v3 }
 0x599   :  { %1397 = vmatpush1.bf16.msra.mxu0 %v2231_v4  ;;  %1438 = vmatpush1.bf16.msra.mxu1 %v2233_v5 }
 0x59a   :  { %1500 = vmatprep.subr.bf16.mxu0 %v2523_v36  ;;  %1541 = vmatprep.subr.bf16.mxu1 %v2526_v37 }
 0x64f   :  { %v1298_v58 = vpop.f32.mrb[36].mxu0  ;;  %v1339_v59 = vpop.f32.mrb[36].mxu1 }
 0x650   :  { %v1346_v61 = vadd.f32 %v1298_v58, %v2700_v60  ;;  %v1348_v63 = vadd.f32 %v1339_v59, %v2701_v42  ;;  %v1300_v43 = vpop.f32.mrb[37].mxu0  ;;  %v1341_v1 = vpop.f32.mrb[37].mxu1 }
 0x651   :  { %v1347_v2 = vadd.f32 %v1300_v43, %v2702_v45  ;;  %v1349_v3 = vadd.f32 %v1341_v1, %v2703_v46  ;;  %v1302_v47 = vpop.f32.mrb[38].mxu0  ;;  %v1343_v4 = vpop.f32.mrb[38].mxu1 }
 0x652   :  { %v1717_v48 = vmul.f32 -1.442695, %v1348_v63  ;;  %v1303_v5 = vpop.f32.mrb[39].mxu0  ;;  %v1344_v49 = vpop.f32.mrb[39].mxu1 }
 0x653   :  { %v1716_v36 = vmul.f32 -1.442695, %v1347_v2  ;;  %v1718_v37 = vmul.f32 -1.442695, %v1349_v3 }
 0x654   :  { %1913 = vpow2.f32 %v1717_v48 }
 0x655   :  { %1915 = vpow2.f32 %v1716_v36 }
 0x656   :  { %1917 = vpow2.f32 %v1718_v37  ;;  %v2708_v37 = vld [vmem:[#allocation31_spill] sm:$0xff] }
 0x657   :  { %1919 = vtanh.f32 %v1346_v61 }
 0x65e   :  { %v1914_v50 = vpop.eup %1913 }
 0x65f   :  { %v1916_v51 = vpop.eup %1915  ;;  %v1361_v52 = vadd.f32 1.0, %v1914_v50 }
 0x660   :  { %v1360_v54 = vadd.f32 1.0, %v1916_v51  ;;  %v1918_v55 = vpop.eup %1917  ;;  %v2709_v51 = vld [vmem:[#allocation32_spill] sm:$0xff] }
 0x661   :  { %1921 = vrcp.f32 %v1361_v52  ;;  %v1920_v56 = vpop.eup %1919  ;;  %v1362_v14 = vadd.f32 1.0, %v1918_v55 }
 0x662   :  { %1923 = vrcp.f32 %v1360_v54 }
 0x663   :  { %1925 = vrcp.f32 %v1362_v14 }
 0x66b   :  { %v1922_v57 = vpop.eup %1921 }
 0x66c   :  { %v1924_v13 = vpop.eup %1923  ;;  %v1370_v15 = vmul.f32 %v1922_v57, %v2534_v26  ;;  %v1987_v26 = vld [vmem:[#allocation8 + $0xc0] ss:$16 sps:$4 sm:$0xff]  }
 0x66d   :  { %v1369_v16 = vmul.f32 %v1924_v13, %v1920_v56  ;;  %v1926_v17 = vpop.eup %1925  ;;  %v2710_v56 = vld [vmem:[#allocation33_spill] sm:$0xff]  ;;  %v2711_v13 = vld [vmem:[#allocation34_spill] sm:$0xff] }
 0x66f   :  { %v2616_v18 = vadd.f32 %v1370_v15, %v1369_v16 }
 0x671   :  { %1927 = vtanh.f32 %v2616_v18 }
 0x67b   :  { %v1928_v19 = vpop.eup %1927 }
 0x67c   :  { %v1373_v0 = vmul.f32 %v1928_v19, %v1926_v17 }
 0x67e   :  { %1375 = vst [vmem:[#allocation10 + $0x28] sm:$0xff] %v1373_v0  ;;  %v1376_v20 = vpack.c.bf16 %v1373_v0, %v1373_v0 }
 0x680   :  { %1415 = vmatmul.mubr.bf16.vlgmr.msra.gmra.mrb[40].mxu0 %v1376_v20  ;;  %1456 = vmatmul.mubr.bf16.vlgmr.msra.gmra.mrb[40].mxu1 %v1376_v20 }
 0x681   :  { %1501 = vmatpush1.bf16.msra.mxu0 %v2537_v32  ;;  %1542 = vmatpush1.bf16.msra.mxu1 %v2540_v44  ;;  %v1992_v32 = vld [vmem:[#allocation8 + $0xe8] ss:$16 sps:$4 sm:$0xff]  }
 0x682   :  { %1502 = vmatprep.subr.bf16.mxu0 %v2543_v62  ;;  %1543 = vmatprep.subr.bf16.mxu1 %v2546_v29  ;;  %v2704_v29 = vld [vmem:[#allocation27_spill] sm:$0xff] }
 0x683   :  { %1532 = vmatprep.mubr.bf16.mxu0 %v2690_v35  ;;  %1573 = vmatprep.mubr.bf16.mxu1 %v2690_v35  ;;  %v1983_v35 = vld [vmem:[#allocation8 + $0xa0] ss:$16 sps:$4 sm:$0xff]  }
 0x685   :  { %1503 = vmatpush1.bf16.msra.mxu0 %v2551_v22  ;;  %1544 = vmatpush1.bf16.msra.mxu1 %v2554_v7  ;;  %v2705_v7 = vld [vmem:[#allocation28_spill] sm:$0xff] }
 0x686   :  { %1504 = vmatprep.subr.bf16.mxu0 %v2557_v11  ;;  %1545 = vmatprep.subr.bf16.mxu1 %v2560_v25 }
 0x689   :  { %1505 = vmatpush1.bf16.msra.mxu0 %v2563_v30  ;;  %1546 = vmatpush1.bf16.msra.mxu1 %v2566_v8  ;;  %v2706_v8 = vld [vmem:[#allocation29_spill] sm:$0xff] }
 0x68a   :  { %1506 = vmatprep.subr.bf16.mxu0 %v2569_v6  ;;  %1547 = vmatprep.subr.bf16.mxu1 %v2572_v53  ;;  %v2707_v53 = vld [vmem:[#allocation30_spill] sm:$0xff] }
 0x68d   :  { %1507 = vmatpush1.bf16.msra.mxu0 %v2575_v12  ;;  %1548 = vmatpush1.bf16.msra.mxu1 %v2578_v10 }
 0x68e   :  { %1508 = vmatprep.subr.bf16.mxu0 %v2581_v23  ;;  %1549 = vmatprep.subr.bf16.mxu1 %v2584_v31 }
 0x691   :  { %1509 = vmatpush1.bf16.msra.mxu0 %v2587_v38  ;;  %1550 = vmatpush1.bf16.msra.mxu1 %v2590_v39 }
 0x692   :  { %1510 = vmatprep.subr.bf16.mxu0 %v2593_v40  ;;  %1551 = vmatprep.subr.bf16.mxu1 %v2596_v41 }
 0x695   :  { %1511 = vmatpush1.bf16.msra.mxu0 %v1983_v35  ;;  %1552 = vmatpush1.bf16.msra.mxu1 %v1984_v21 }
 0x696   :  { %1512 = vmatprep.subr.bf16.mxu0 %v1985_v27  ;;  %1553 = vmatprep.subr.bf16.mxu1 %v1986_v24 }
 0x699   :  { %1513 = vmatpush1.bf16.msra.mxu0 %v1987_v26  ;;  %1554 = vmatpush1.bf16.msra.mxu1 %v1988_v28 }
 0x69a   :  { %1514 = vmatprep.subr.bf16.mxu0 %v1989_v9  ;;  %1555 = vmatprep.subr.bf16.mxu1 %v1990_v33 }
 0x69d   :  { %1515 = vmatpush1.bf16.msra.mxu0 %v1991_v34  ;;  %1556 = vmatpush1.bf16.msra.mxu1 %v1992_v32 }
 0x753   :  { %v1416_v44 = vpop.f32.mrb[40].mxu0  ;;  %v1457_v62 = vpop.f32.mrb[40].mxu1 }
 0x754   :  { %v1464_v22 = vadd.f32 %v1416_v44, %v2704_v29  ;;  %v1466_v11 = vadd.f32 %v1457_v62, %v2705_v7  ;;  %v1418_v25 = vpop.f32.mrb[41].mxu0  ;;  %v1459_v30 = vpop.f32.mrb[41].mxu1 }
 0x755   :  { %v1465_v6 = vadd.f32 %v1418_v25, %v2706_v8  ;;  %v1467_v12 = vadd.f32 %v1459_v30, %v2707_v53  ;;  %v1420_v10 = vpop.f32.mrb[42].mxu0  ;;  %v1461_v23 = vpop.f32.mrb[42].mxu1 }
 0x756   :  { %v1720_v31 = vmul.f32 -1.442695, %v1466_v11  ;;  %v1421_v38 = vpop.f32.mrb[43].mxu0  ;;  %v1462_v39 = vpop.f32.mrb[43].mxu1 }
 0x757   :  { %v1719_v40 = vmul.f32 -1.442695, %v1465_v6  ;;  %v1721_v41 = vmul.f32 -1.442695, %v1467_v12 }
 0x758   :  { %1929 = vpow2.f32 %v1720_v31 }
 0x759   :  { %1931 = vpow2.f32 %v1719_v40 }
 0x75a   :  { %1933 = vpow2.f32 %v1721_v41 }
 0x75b   :  { %1935 = vtanh.f32 %v1464_v22 }
 0x762   :  { %v1930_v58 = vpop.eup %1929 }
 0x763   :  { %v1932_v59 = vpop.eup %1931  ;;  %v1479_v60 = vadd.f32 1.0, %v1930_v58 }
 0x764   :  { %v1478_v61 = vadd.f32 1.0, %v1932_v59  ;;  %v1934_v42 = vpop.eup %1933 }
 0x765   :  { %1937 = vrcp.f32 %v1479_v60  ;;  %v1936_v63 = vpop.eup %1935  ;;  %v1480_v2 = vadd.f32 1.0, %v1934_v42 }
 0x766   :  { %1939 = vrcp.f32 %v1478_v61 }
 0x767   :  { %1941 = vrcp.f32 %v1480_v2 }
 0x76f   :  { %v1938_v43 = vpop.eup %1937 }
 0x770   :  { %v1940_v1 = vpop.eup %1939  ;;  %v1488_v45 = vmul.f32 %v1938_v43, %v2616_v18 }
 0x771   :  { %v1487_v46 = vmul.f32 %v1940_v1, %v1936_v63  ;;  %v1942_v47 = vpop.eup %1941 }
 0x773   :  { %v1489_v3 = vadd.f32 %v1488_v45, %v1487_v46 }
 0x775   :  { %1943 = vtanh.f32 %v1489_v3 }
 0x77f   :  { %v1944_v4 = vpop.eup %1943 }
 0x780   :  { %v1491_v48 = vmul.f32 %v1944_v4, %v1942_v47 }
 0x782   :  { %1493 = vst [vmem:[#allocation10 + $0x30] sm:$0xff] %v1491_v48  ;;  %v1494_v5 = vpack.c.bf16 %v1491_v48, %v1491_v48 }
 0x784   :  { %1533 = vmatmul.mubr.bf16.vlgmr.msra.gmra.mrb[44].mxu0 %v1494_v5  ;;  %1574 = vmatmul.mubr.bf16.vlgmr.msra.gmra.mrb[44].mxu1 %v1494_v5 }
 0x857   :  { %v1534_v49 = vpop.f32.mrb[44].mxu0  ;;  %v1575_v36 = vpop.f32.mrb[44].mxu1 }
 0x858   :  { %v1582_v50 = vadd.f32 %v1534_v49, %v2708_v37  ;;  %v1584_v52 = vadd.f32 %v1575_v36, %v2709_v51  ;;  %v1536_v54 = vpop.f32.mrb[45].mxu0  ;;  %v1577_v55 = vpop.f32.mrb[45].mxu1 }
 0x859   :  { %v1583_v57 = vadd.f32 %v1536_v54, %v2710_v56  ;;  %v1585_v15 = vadd.f32 %v1577_v55, %v2711_v13  ;;  %v1538_v14 = vpop.f32.mrb[46].mxu0  ;;  %v1579_v16 = vpop.f32.mrb[46].mxu1 }
 0x85a   :  { %v1723_v18 = vmul.f32 -1.442695, %v1584_v52  ;;  %v1539_v17 = vpop.f32.mrb[47].mxu0  ;;  %v1580_v19 = vpop.f32.mrb[47].mxu1 }
 0x85b   :  { %v1722_v0 = vmul.f32 -1.442695, %v1583_v57  ;;  %v1724_v20 = vmul.f32 -1.442695, %v1585_v15 }
 0x85c   :  { %1945 = vpow2.f32 %v1723_v18 }
 0x85d   :  { %1947 = vpow2.f32 %v1722_v0 }
 0x85e   :  { %1949 = vpow2.f32 %v1724_v20 }
 0x85f   :  { %1951 = vtanh.f32 %v1582_v50 }
 0x866   :  { %v1946_v35 = vpop.eup %1945 }
 0x867   :  { %v1948_v21 = vpop.eup %1947  ;;  %v1597_v27 = vadd.f32 1.0, %v1946_v35 }
 0x868   :  { %v1596_v24 = vadd.f32 1.0, %v1948_v21  ;;  %v1950_v26 = vpop.eup %1949 }
 0x869   :  { %1953 = vrcp.f32 %v1597_v27  ;;  %v1952_v28 = vpop.eup %1951  ;;  %v1598_v32 = vadd.f32 1.0, %v1950_v26 }
 0x86a   :  { %1955 = vrcp.f32 %v1596_v24 }
 0x86b   :  { %1957 = vrcp.f32 %v1598_v32 }
 0x873   :  { %v1954_v9 = vpop.eup %1953 }
 0x874   :  { %v1956_v33 = vpop.eup %1955  ;;  %v1606_v34 = vmul.f32 %v1954_v9, %v1489_v3 }
 0x875   :  { %v1605_v44 = vmul.f32 %v1956_v33, %v1952_v28  ;;  %v1958_v29 = vpop.eup %1957 }
 0x877   :  { %v1607_v62 = vadd.f32 %v1606_v34, %v1605_v44 }
 0x879   :  { %1959 = vtanh.f32 %v1607_v62 }
 0x883   :  { %v1960_v22 = vpop.eup %1959 }
 0x884   :  { %v1609_v7 = vmul.f32 %v1960_v22, %v1958_v29 }
 0x886   :  { %1611 = vst [vmem:[#allocation10 + $0x38] sm:$0xff] %v1609_v7  ;;  %v1612_v11 = vpack.c.bf16 %v1609_v7, %v1609_v7 }
 0x887   :  { %2048 = shalt.err (!%p2045_p6)
}
 0x888   :  { %s2049_s26 = scalar_lea.hbm %s2666_s4, 1024 }
 0x889   :  { %p2050_p7 = scmp.ne.s32.totalorder %s2666_s4, %s2049_s26  ;;  %p2053_p8 = scmp.lt.u32.totalorder %s2049_s26, %s2666_s4 }
 0x88b   :  { %p2055_p9 = pnand %p2053_p8, %p2050_p7 }
 0x88d   :  { %2058 = shalt.err (!%p2055_p9)
}
 0x88e   :  { %s2071_s5 = smov 128   ;;  %s2072_s6 = smov 8   ;;  %1613 = vst [vmem:[#allocation3] sm:$0xf] %v1612_v11 }
 0x88f   :  { %1626 = dma.vmem_to_hbm [thread:$0]  %s1621_s22, 1024, %s2666_s4, [#allocation7], %s2071_s5, %s2071_s5, %s2072_s6  }
 0x890   :  { %2063 = dma.done.wait [#allocation7], 1024  }
 0x891   :  { %2064 = vsyncadd [#allocation7], 4294966272 }
 0x892   :  { %1630 = vsyncpa [#allocation6], 1 }
 0x893   :  { %1631 = vsyncpa [#allocation9], 1 }
 0x894   :  { %1632 = vsyncpa [#allocation7], 1 }

</bundles_post_ra>
